<compile_context>
chip_gen: v6e
topology: v6e:2x2x1
jax: 0.10.0
libtpu: 0.0.40
codegen_flags: <defaults>
</compile_context>

<pallas_src>
import jax
import jax.numpy as jnp
from jax import lax
from jax.experimental import pallas as pl
from jax.experimental.pallas import tpu as pltpu


def _pad_lr(kernel_size, dilation=1):
    """Replication-pad sizes exactly as in the PyTorch Interactor.__init__."""
    if kernel_size % 2 == 0:
        pad_l = dilation * (kernel_size - 2) // 2 + 1
        pad_r = dilation * kernel_size // 2 + 1
    else:
        pad_l = dilation * (kernel_size - 1) // 2 + 1
        pad_r = dilation * (kernel_size - 1) // 2 + 1
    return pad_l, pad_r


def _vmem_bytes_estimate(batch_tile, t2, d, dh, k1, k2, io_isz, mxu_isz):
    """Rough per-grid-step VMEM footprint (weights + double-buffered IO + f32 work)."""
    weights = 4 * (k1 * d * dh + k2 * dh * d) * mxu_isz + 4 * (dh + d) * 4
    io = 2 * batch_tile * t2 * 2 * d * io_isz            # input block, 2 buffers
    io += 2 * 2 * batch_tile * d * t2 * io_isz           # two outputs, 2 buffers each
    work = 4 * batch_tile * (t2 + k1 + k2) * (k1 * d + k2 * dh + 3 * d + dh)
    return weights + io + work


def _make_interactor_kernel(batch_tile, t2, d_in, d_hid, k1, k2, pad_l, pad_r,
                            inn, mxu_dtype):
    t_pad = t2 + pad_l + pad_r
    t_mid = t_pad - k1 + 1                 # length after first (VALID) conv
    assert t_mid - (k2 - 1) == t2, "pad/kernel combination must preserve length"

    # im2col only pays when C_in underfills the MXU contraction dim.
    im2col_1 = d_in < 128
    im2col_2 = d_hid < 128

    def kernel(x_ref, w1_ref, b1_ref, w2_ref, b2_ref, even_ref, odd_ref):
        # x_ref : (bt, T2, 2*D)   even/odd interleaved on lanes (free HBM reshape)
        # w1_ref: (4, K1*D, Dh)   mxu_dtype     b1_ref: (4, 1, Dh) f32
        # w2_ref: (4, K2*Dh, D)   mxu_dtype     b2_ref: (4, 1, D)  f32
        # even_ref / odd_ref: (bt, D, T2)  channel-first (PyTorch layout)

        def flat(a):
            # (bt, t, c) -> (bt*t, c). For bt == 1 this is a unit-dim squeeze
            # (layout no-op); for bt > 1 Mosaic relayouts across sublanes.
            return a.reshape(batch_tile * a.shape[1], a.shape[2])

        def unflat(a, t_out):
            return a.reshape(batch_tile, t_out, a.shape[-1])

        x_all = x_ref[...].astype(jnp.float32)            # (bt, T2, 2D)
        x_even = x_all[:, :, :d_in]                       # lane slice, in-VMEM
        x_odd = x_all[:, :, d_in:2 * d_in]

        def conv(xv, t_out, ksize, c_in, w_ref, b_ref, bi, use_im2col):
            # Conv1d (stride 1, dilation 1, VALID) over the whole batch tile,
            # batch folded into the matmul M dim; bf16 operands, f32 accumulate.
            if use_im2col:
                taps = [xv[:, k:k + t_out, :] for k in range(ksize)]
                cols = jnp.concatenate(taps, axis=-1)     # (bt, t_out, K*C_in)
                mat = flat(cols).astype(mxu_dtype)        # (bt*t_out, K*C_in)
                y = jnp.dot(mat, w_ref[bi], preferred_element_type=jnp.float32)
            else:
                y = None
                for k in range(ksize):
                    tap = flat(xv[:, k:k + t_out, :]).astype(mxu_dtype)
                    w_k = w_ref[bi, k * c_in:(k + 1) * c_in, :]
                    p = jnp.dot(tap, w_k, preferred_element_type=jnp.float32)
                    y = p if y is None else y + p
            y = y + b_ref[bi]                             # one (1, C_out) bias add
            return unflat(y, t_out)

        def branch(xv, bi):
            # ReplicationPad1d -> Conv1d(K1) -> LeakyReLU(0.01) -> Dropout
            #   -> Conv1d(K2) -> Tanh, on the whole (bt, T2, D) tile at once.
            left = jnp.broadcast_to(xv[:, 0:1, :], (batch_tile, pad_l, d_in))
            right = jnp.broadcast_to(xv[:, t2 - 1:t2, :], (batch_tile, pad_r, d_in))
            xp = jnp.concatenate([left, xv, right], axis=1)     # (bt, t_pad, D)
            h = conv(xp, t_mid, k1, d_in, w1_ref, b1_ref, bi, im2col_1)
            h = jnp.where(h >= 0, h, 0.01 * h)                  # LeakyReLU(0.01)
            # TODO(synk): nn.Dropout is identity here (inference/eval semantics).
            y = conv(h, t2, k2, d_hid, w2_ref, b2_ref, bi, im2col_2)
            return jnp.tanh(y)                                  # (bt, T2, D), f32

        if inn:                                     # "modified" / INN path
            d = x_odd * jnp.exp(branch(x_even, 0))          # phi
            c = x_even * jnp.exp(branch(x_odd, 1))          # psi
            even_upd = c + branch(d, 2)                     # U
            odd_upd = d - branch(c, 3)                      # P
        else:
            d = x_odd - branch(x_even, 3)                   # P
            c = x_even + branch(d, 2)                       # U
            even_upd, odd_upd = c, d

        # Emit channel-first (B, D, T2) directly: in-kernel XLU transpose of
        # the resident VMEM tile removes the standalone XLA transpose (and its
        # extra HBM round trip) from the wrapper.
        even_ref[...] = jnp.swapaxes(even_upd, 1, 2).astype(even_ref.dtype)
        odd_ref[...] = jnp.swapaxes(odd_upd, 1, 2).astype(odd_ref.dtype)

    return kernel


def interactor_level_forward(x, params, *, kernel_size=5, groups=1, inn=True,
                             batch_tile=None, mxu_dtype=jnp.bfloat16):
    """Fused Pallas forward of InteractorLevel. Returns (even_update, odd_update),
    each of shape (B, D, T//2) (channel-first, matching the PyTorch module)."""
    # TODO(synk): grouped Conv1d (groups > 1) not implemented; module default is 1.
    assert groups == 1, "Pallas kernel implements groups=1 (dense Conv1d)"
    B, T, D = x.shape
    assert T % 2 == 0, "sequence length must be even (SCINet usage)"
    T2 = T // 2
    pad_l, pad_r = _pad_lr(kernel_size, 1)
    K1, K2 = kernel_size, 3
    Dh = params['phi']['w1'].shape[0]

    names = ('phi', 'psi', 'U', 'P')
    # Conv1d weights (C_out, C_in, K) -> im2col layout (K*C_in, C_out), bf16 for
    # native MXU bf16 x bf16 -> f32 (also halves weight VMEM / DMA bytes).
    w1 = jnp.stack([jnp.transpose(params[n]['w1'], (2, 1, 0)).reshape(K1 * D, Dh)
                    for n in names]).astype(mxu_dtype)          # (4, K1*D, Dh)
    b1 = jnp.stack([params[n]['b1'].reshape(1, -1) for n in names]
                   ).astype(jnp.float32)                        # (4, 1, Dh)
    w2 = jnp.stack([jnp.transpose(params[n]['w2'], (2, 1, 0)).reshape(K2 * Dh, D)
                    for n in names]).astype(mxu_dtype)          # (4, K2*Dh, D)
    b2 = jnp.stack([params[n]['b2'].reshape(1, -1) for n in names]
                   ).astype(jnp.float32)                        # (4, 1, D)

    # Even/odd stay interleaved in HBM: this reshape is a free row-major
    # metadata change; the actual de-interleave is two lane slices in-kernel.
    x2 = x.reshape(B, T2, 2 * D)

    io_isz = x.dtype.itemsize
    mxu_isz = jnp.dtype(mxu_dtype).itemsize
    if batch_tile is None:
        bytes_per_sample = max(T * D * io_isz, 1)
        bt = max(1, min(B, (1 << 19) // bytes_per_sample))   # ~512 KiB input block
        if B >= 2:
            bt = min(bt, B // 2)           # keep >=2 grid steps (dual-TC / megacore)
        while bt > 1 and B % bt:
            bt -= 1
        # Keep the per-step footprint comfortably inside v7x's 64 MiB VMEM.
        while bt > 1 and _vmem_bytes_estimate(bt, T2, D, Dh, K1, K2,
                                              io_isz, mxu_isz) > 24 * 2**20:
            bt = max(1, bt // 2)
            while bt > 1 and B % bt:
                bt -= 1
        batch_tile = bt
    assert B % batch_tile == 0

    est = _vmem_bytes_estimate(batch_tile, T2, D, Dh, K1, K2, io_isz, mxu_isz)
    vmem_limit = int(min(64 * 2**20, 2 * est)) if est > 12 * 2**20 else None

    kernel = _make_interactor_kernel(batch_tile, T2, D, Dh, K1, K2,
                                     pad_l, pad_r, inn, mxu_dtype)

    even, odd = pl.pallas_call(
        kernel,
        out_shape=(jax.ShapeDtypeStruct((B, D, T2), x.dtype),
                   jax.ShapeDtypeStruct((B, D, T2), x.dtype)),
        grid=(B // batch_tile,),
        in_specs=[
            pl.BlockSpec((batch_tile, T2, 2 * D), lambda b: (b, 0, 0)),
            pl.BlockSpec((4, K1 * D, Dh), lambda b: (0, 0, 0)),   # resident weights
            pl.BlockSpec((4, 1, Dh), lambda b: (0, 0, 0)),
            pl.BlockSpec((4, K2 * Dh, D), lambda b: (0, 0, 0)),
            pl.BlockSpec((4, 1, D), lambda b: (0, 0, 0)),
        ],
        out_specs=(
            pl.BlockSpec((batch_tile, D, T2), lambda b: (b, 0, 0)),
            pl.BlockSpec((batch_tile, D, T2), lambda b: (b, 0, 0)),
        ),
        compiler_params=pltpu.CompilerParams(
            dimension_semantics=("parallel",),
            vmem_limit_bytes=vmem_limit),
    )(x2, w1, b1, w2, b2)

    return even, odd


# ----------------------------- pure-JAX reference -----------------------------
def _ref_branch(x_ct, w1, b1, w2, b2, pad_l, pad_r):
    # x_ct: (B, C, T) channel-first, mirroring the PyTorch nn.Sequential (f32).
    xp = jnp.concatenate([jnp.repeat(x_ct[:, :, :1], pad_l, axis=2),
                          x_ct,
                          jnp.repeat(x_ct[:, :, -1:], pad_r, axis=2)], axis=2)
    h = lax.conv_general_dilated(
        xp, w1, window_strides=(1,), padding='VALID',
        dimension_numbers=('NCH', 'OIH', 'NCH'),
        precision=lax.Precision.HIGHEST) + b1[None, :, None]
    h = jnp.where(h >= 0, h, 0.01 * h)
    y = lax.conv_general_dilated(
        h, w2, window_strides=(1,), padding='VALID',
        dimension_numbers=('NCH', 'OIH', 'NCH'),
        precision=lax.Precision.HIGHEST) + b2[None, :, None]
    return jnp.tanh(y)


def interactor_level_ref(x, params, kernel_size, inn=True):
    pad_l, pad_r = _pad_lr(kernel_size, 1)
    x_even = jnp.swapaxes(x[:, ::2, :], 1, 2)    # (B, D, T2)
    x_odd = jnp.swapaxes(x[:, 1::2, :], 1, 2)

    def br(name, v):
        p = params[name]
        return _ref_branch(v, p['w1'], p['b1'], p['w2'], p['b2'], pad_l, pad_r)

    if inn:
        d = x_odd * jnp.exp(br('phi', x_even))
        c = x_even * jnp.exp(br('psi', x_odd))
        return c + br('U', d), d - br('P', c)
    else:
        d = x_odd - br('P', x_even)
        c = x_even + br('U', d)
        return c, d


if __name__ == "__main__":
    key = jax.random.PRNGKey(0)
    B, T, D = 2, 16, 32                    # batch=2, seq=16, in_planes=32
    kernel_size, hidden_size, groups = 5, 1, 1
    Dh = int(D * hidden_size)
    K2 = 3

    keys = jax.random.split(key, 17)
    x = jax.random.normal(keys[0], (B, T, D), dtype=jnp.float32)

    def conv_init(k_w, k_b, c_out, c_in, ksz):
        scale = (c_in * ksz) ** -0.5       # matches PyTorch Conv1d default init
        w = jax.random.uniform(k_w, (c_out, c_in, ksz), jnp.float32, -scale, scale)
        b = jax.random.uniform(k_b, (c_out,), jnp.float32, -scale, scale)
        return w, b

    params = {}
    ki = 1
    for name in ('phi', 'psi', 'U', 'P'):
        w1, b1 = conv_init(keys[ki], keys[ki + 1], Dh, D, kernel_size); ki += 2
        w2, b2 = conv_init(keys[ki], keys[ki + 1], D, Dh, K2); ki += 2
        params[name] = dict(w1=w1, b1=b1, w2=w2, b2=b2)

    even_out, odd_out = interactor_level_forward(
        x, params, kernel_size=kernel_size, groups=groups, inn=True)
    even_out = jax.block_until_ready(even_out)
    odd_out = jax.block_until_ready(odd_out)

    ref_even, ref_odd = interactor_level_ref(x, params, kernel_size, inn=True)
    assert even_out.shape == ref_even.shape == (B, D, T // 2)
    assert odd_out.shape == ref_odd.shape == (B, D, T // 2)
    # bf16 MXU operands (f32 accumulate, f32 exp/tanh/interaction) vs f32 ref.
    assert bool(jnp.allclose(even_out, ref_even, rtol=3e-2, atol=3e-2))
    assert bool(jnp.allclose(odd_out, ref_odd, rtol=3e-2, atol=3e-2))

    print("KERNEL_OK")
</pallas_src>

<mosaic_0001>
module attributes {stable_mosaic.version = 11 : i64} {
  func.func @kernel(%arg0: i32, %arg1: memref<1x8x64xf32, #tpu.memory_space<vmem>>, %arg2: memref<4x160x32xbf16, #tpu.memory_space<vmem>>, %arg3: memref<4x1x32xf32, #tpu.memory_space<vmem>>, %arg4: memref<4x96x32xbf16, #tpu.memory_space<vmem>>, %arg5: memref<4x1x32xf32, #tpu.memory_space<vmem>>, %arg6: memref<1x32x8xf32, #tpu.memory_space<vmem>>, %arg7: memref<1x32x8xf32, #tpu.memory_space<vmem>>) attributes {dimension_semantics = [#tpu.dimension_semantics<parallel>], iteration_bounds = array<i64: 2>, scalar_prefetch = 0 : i64, scratch_operands = 0 : i64, tpu.core_type = #tpu.core_type<tc>, window_params = [{transform_indices = @transform_0, window_bounds = array<i64: 1, 8, 64>}, {pipeline_mode = #tpu.pipeline_mode<synchronous>, transform_indices = @transform_1, window_bounds = array<i64: 4, 160, 32>}, {pipeline_mode = #tpu.pipeline_mode<synchronous>, transform_indices = @transform_2, window_bounds = array<i64: 4, 1, 32>}, {pipeline_mode = #tpu.pipeline_mode<synchronous>, transform_indices = @transform_3, window_bounds = array<i64: 4, 96, 32>}, {pipeline_mode = #tpu.pipeline_mode<synchronous>, transform_indices = @transform_4, window_bounds = array<i64: 4, 1, 32>}, {transform_indices = @transform_5, window_bounds = array<i64: 1, 32, 8>}, {transform_indices = @transform_6, window_bounds = array<i64: 1, 32, 8>}]} {
    %c0 = arith.constant 0 : index
    %c0_0 = arith.constant 0 : index
    %c0_1 = arith.constant 0 : index
    %0 = vector.load %arg1[%c0, %c0_0, %c0_1] : memref<1x8x64xf32, #tpu.memory_space<vmem>>, vector<1x8x64xf32>
    %1 = vector.extract_strided_slice %0 {offsets = [0, 0, 0], sizes = [1, 8, 32], strides = [1, 1, 1]} : vector<1x8x64xf32> to vector<1x8x32xf32>
    %2 = vector.extract_strided_slice %0 {offsets = [0, 0, 32], sizes = [1, 8, 32], strides = [1, 1, 1]} : vector<1x8x64xf32> to vector<1x8x32xf32>
    %3 = vector.extract_strided_slice %1 {offsets = [0, 0, 0], sizes = [1, 1, 32], strides = [1, 1, 1]} : vector<1x8x32xf32> to vector<1x1x32xf32>
    %4 = vector.shape_cast %3 : vector<1x1x32xf32> to vector<1x1x32xf32>
    %5 = vector.broadcast %4 : vector<1x1x32xf32> to vector<1x3x32xf32>
    %6 = vector.extract_strided_slice %1 {offsets = [0, 7, 0], sizes = [1, 1, 32], strides = [1, 1, 1]} : vector<1x8x32xf32> to vector<1x1x32xf32>
    %7 = vector.shape_cast %6 : vector<1x1x32xf32> to vector<1x1x32xf32>
    %8 = vector.broadcast %7 : vector<1x1x32xf32> to vector<1x3x32xf32>
    %9 = tpu.concatenate %5, %1, %8 in 1 : vector<1x3x32xf32>, vector<1x8x32xf32>, vector<1x3x32xf32> -> vector<1x14x32xf32>
    %10 = vector.extract_strided_slice %9 {offsets = [0, 0, 0], sizes = [1, 10, 32], strides = [1, 1, 1]} : vector<1x14x32xf32> to vector<1x10x32xf32>
    %11 = vector.extract_strided_slice %9 {offsets = [0, 1, 0], sizes = [1, 10, 32], strides = [1, 1, 1]} : vector<1x14x32xf32> to vector<1x10x32xf32>
    %12 = vector.extract_strided_slice %9 {offsets = [0, 2, 0], sizes = [1, 10, 32], strides = [1, 1, 1]} : vector<1x14x32xf32> to vector<1x10x32xf32>
    %13 = vector.extract_strided_slice %9 {offsets = [0, 3, 0], sizes = [1, 10, 32], strides = [1, 1, 1]} : vector<1x14x32xf32> to vector<1x10x32xf32>
    %14 = vector.extract_strided_slice %9 {offsets = [0, 4, 0], sizes = [1, 10, 32], strides = [1, 1, 1]} : vector<1x14x32xf32> to vector<1x10x32xf32>
    %15 = tpu.concatenate %10, %11, %12, %13, %14 in 2 : vector<1x10x32xf32>, vector<1x10x32xf32>, vector<1x10x32xf32>, vector<1x10x32xf32>, vector<1x10x32xf32> -> vector<1x10x160xf32>
    %16 = vector.shape_cast %15 : vector<1x10x160xf32> to vector<10x160xf32>
    %17 = arith.truncf %16 : vector<10x160xf32> to vector<10x160xbf16>
    %c0_2 = arith.constant 0 : index
    %c0_3 = arith.constant 0 : index
    %c0_4 = arith.constant 0 : index
    %18 = vector.load %arg2[%c0_2, %c0_3, %c0_4] : memref<4x160x32xbf16, #tpu.memory_space<vmem>>, vector<1x160x32xbf16>
    %19 = vector.shape_cast %18 : vector<1x160x32xbf16> to vector<160x32xbf16>
    %cst = arith.constant dense<0.000000e+00> : vector<10x32xf32>
    %20 = tpu.matmul %17, %19, %cst {dimension_numbers = #tpu.dot_dimension_numbers<[1], [0], [0], [1], [0, 0, 1, 1], [], []>} : vector<10x160xbf16>, vector<160x32xbf16>, vector<10x32xf32> -> vector<10x32xf32>
    %c0_5 = arith.constant 0 : index
    %c0_6 = arith.constant 0 : index
    %c0_7 = arith.constant 0 : index
    %21 = vector.load %arg3[%c0_5, %c0_6, %c0_7] : memref<4x1x32xf32, #tpu.memory_space<vmem>>, vector<1x1x32xf32>
    %22 = vector.shape_cast %21 : vector<1x1x32xf32> to vector<1x32xf32>
    %23 = vector.broadcast %22 : vector<1x32xf32> to vector<10x32xf32>
    %24 = arith.addf %20, %23 : vector<10x32xf32>
    %25 = vector.shape_cast %24 : vector<10x32xf32> to vector<1x10x32xf32>
    %cst_8 = arith.constant 0.000000e+00 : f32
    %26 = vector.broadcast %cst_8 : f32 to vector<1x10x32xf32>
    %27 = arith.cmpf oge, %25, %26 : vector<1x10x32xf32>
    %cst_9 = arith.constant 0.00999999977 : f32
    %28 = vector.broadcast %cst_9 : f32 to vector<1x10x32xf32>
    %29 = arith.mulf %28, %25 : vector<1x10x32xf32>
    %30 = arith.select %27, %25, %29 : vector<1x10x32xi1>, vector<1x10x32xf32>
    %31 = vector.extract_strided_slice %30 {offsets = [0, 0, 0], sizes = [1, 8, 32], strides = [1, 1, 1]} : vector<1x10x32xf32> to vector<1x8x32xf32>
    %32 = vector.extract_strided_slice %30 {offsets = [0, 1, 0], sizes = [1, 8, 32], strides = [1, 1, 1]} : vector<1x10x32xf32> to vector<1x8x32xf32>
    %33 = vector.extract_strided_slice %30 {offsets = [0, 2, 0], sizes = [1, 8, 32], strides = [1, 1, 1]} : vector<1x10x32xf32> to vector<1x8x32xf32>
    %34 = tpu.concatenate %31, %32, %33 in 2 : vector<1x8x32xf32>, vector<1x8x32xf32>, vector<1x8x32xf32> -> vector<1x8x96xf32>
    %35 = vector.shape_cast %34 : vector<1x8x96xf32> to vector<8x96xf32>
    %36 = arith.truncf %35 : vector<8x96xf32> to vector<8x96xbf16>
    %c0_10 = arith.constant 0 : index
    %c0_11 = arith.constant 0 : index
    %c0_12 = arith.constant 0 : index
    %37 = vector.load %arg4[%c0_10, %c0_11, %c0_12] : memref<4x96x32xbf16, #tpu.memory_space<vmem>>, vector<1x96x32xbf16>
    %38 = vector.shape_cast %37 : vector<1x96x32xbf16> to vector<96x32xbf16>
    %cst_13 = arith.constant dense<0.000000e+00> : vector<8x32xf32>
    %39 = tpu.matmul %36, %38, %cst_13 {dimension_numbers = #tpu.dot_dimension_numbers<[1], [0], [0], [1], [0, 0, 1, 1], [], []>} : vector<8x96xbf16>, vector<96x32xbf16>, vector<8x32xf32> -> vector<8x32xf32>
    %c0_14 = arith.constant 0 : index
    %c0_15 = arith.constant 0 : index
    %c0_16 = arith.constant 0 : index
    %40 = vector.load %arg5[%c0_14, %c0_15, %c0_16] : memref<4x1x32xf32, #tpu.memory_space<vmem>>, vector<1x1x32xf32>
    %41 = vector.shape_cast %40 : vector<1x1x32xf32> to vector<1x32xf32>
    %42 = vector.broadcast %41 : vector<1x32xf32> to vector<8x32xf32>
    %43 = arith.addf %39, %42 : vector<8x32xf32>
    %44 = vector.shape_cast %43 : vector<8x32xf32> to vector<1x8x32xf32>
    %45 = math.tanh %44 : vector<1x8x32xf32>
    %46 = math.exp %45 : vector<1x8x32xf32>
    %47 = arith.mulf %2, %46 : vector<1x8x32xf32>
    %48 = vector.extract_strided_slice %2 {offsets = [0, 0, 0], sizes = [1, 1, 32], strides = [1, 1, 1]} : vector<1x8x32xf32> to vector<1x1x32xf32>
    %49 = vector.shape_cast %48 : vector<1x1x32xf32> to vector<1x1x32xf32>
    %50 = vector.broadcast %49 : vector<1x1x32xf32> to vector<1x3x32xf32>
    %51 = vector.extract_strided_slice %2 {offsets = [0, 7, 0], sizes = [1, 1, 32], strides = [1, 1, 1]} : vector<1x8x32xf32> to vector<1x1x32xf32>
    %52 = vector.shape_cast %51 : vector<1x1x32xf32> to vector<1x1x32xf32>
    %53 = vector.broadcast %52 : vector<1x1x32xf32> to vector<1x3x32xf32>
    %54 = tpu.concatenate %50, %2, %53 in 1 : vector<1x3x32xf32>, vector<1x8x32xf32>, vector<1x3x32xf32> -> vector<1x14x32xf32>
    %55 = vector.extract_strided_slice %54 {offsets = [0, 0, 0], sizes = [1, 10, 32], strides = [1, 1, 1]} : vector<1x14x32xf32> to vector<1x10x32xf32>
    %56 = vector.extract_strided_slice %54 {offsets = [0, 1, 0], sizes = [1, 10, 32], strides = [1, 1, 1]} : vector<1x14x32xf32> to vector<1x10x32xf32>
    %57 = vector.extract_strided_slice %54 {offsets = [0, 2, 0], sizes = [1, 10, 32], strides = [1, 1, 1]} : vector<1x14x32xf32> to vector<1x10x32xf32>
    %58 = vector.extract_strided_slice %54 {offsets = [0, 3, 0], sizes = [1, 10, 32], strides = [1, 1, 1]} : vector<1x14x32xf32> to vector<1x10x32xf32>
    %59 = vector.extract_strided_slice %54 {offsets = [0, 4, 0], sizes = [1, 10, 32], strides = [1, 1, 1]} : vector<1x14x32xf32> to vector<1x10x32xf32>
    %60 = tpu.concatenate %55, %56, %57, %58, %59 in 2 : vector<1x10x32xf32>, vector<1x10x32xf32>, vector<1x10x32xf32>, vector<1x10x32xf32>, vector<1x10x32xf32> -> vector<1x10x160xf32>
    %61 = vector.shape_cast %60 : vector<1x10x160xf32> to vector<10x160xf32>
    %62 = arith.truncf %61 : vector<10x160xf32> to vector<10x160xbf16>
    %c1 = arith.constant 1 : index
    %c0_17 = arith.constant 0 : index
    %c0_18 = arith.constant 0 : index
    %63 = vector.load %arg2[%c1, %c0_17, %c0_18] : memref<4x160x32xbf16, #tpu.memory_space<vmem>>, vector<1x160x32xbf16>
    %64 = vector.shape_cast %63 : vector<1x160x32xbf16> to vector<160x32xbf16>
    %cst_19 = arith.constant dense<0.000000e+00> : vector<10x32xf32>
    %65 = tpu.matmul %62, %64, %cst_19 {dimension_numbers = #tpu.dot_dimension_numbers<[1], [0], [0], [1], [0, 0, 1, 1], [], []>} : vector<10x160xbf16>, vector<160x32xbf16>, vector<10x32xf32> -> vector<10x32xf32>
    %c1_20 = arith.constant 1 : index
    %c0_21 = arith.constant 0 : index
    %c0_22 = arith.constant 0 : index
    %66 = vector.load %arg3[%c1_20, %c0_21, %c0_22] : memref<4x1x32xf32, #tpu.memory_space<vmem>>, vector<1x1x32xf32>
    %67 = vector.shape_cast %66 : vector<1x1x32xf32> to vector<1x32xf32>
    %68 = vector.broadcast %67 : vector<1x32xf32> to vector<10x32xf32>
    %69 = arith.addf %65, %68 : vector<10x32xf32>
    %70 = vector.shape_cast %69 : vector<10x32xf32> to vector<1x10x32xf32>
    %cst_23 = arith.constant 0.000000e+00 : f32
    %71 = vector.broadcast %cst_23 : f32 to vector<1x10x32xf32>
    %72 = arith.cmpf oge, %70, %71 : vector<1x10x32xf32>
    %cst_24 = arith.constant 0.00999999977 : f32
    %73 = vector.broadcast %cst_24 : f32 to vector<1x10x32xf32>
    %74 = arith.mulf %73, %70 : vector<1x10x32xf32>
    %75 = arith.select %72, %70, %74 : vector<1x10x32xi1>, vector<1x10x32xf32>
    %76 = vector.extract_strided_slice %75 {offsets = [0, 0, 0], sizes = [1, 8, 32], strides = [1, 1, 1]} : vector<1x10x32xf32> to vector<1x8x32xf32>
    %77 = vector.extract_strided_slice %75 {offsets = [0, 1, 0], sizes = [1, 8, 32], strides = [1, 1, 1]} : vector<1x10x32xf32> to vector<1x8x32xf32>
    %78 = vector.extract_strided_slice %75 {offsets = [0, 2, 0], sizes = [1, 8, 32], strides = [1, 1, 1]} : vector<1x10x32xf32> to vector<1x8x32xf32>
    %79 = tpu.concatenate %76, %77, %78 in 2 : vector<1x8x32xf32>, vector<1x8x32xf32>, vector<1x8x32xf32> -> vector<1x8x96xf32>
    %80 = vector.shape_cast %79 : vector<1x8x96xf32> to vector<8x96xf32>
    %81 = arith.truncf %80 : vector<8x96xf32> to vector<8x96xbf16>
    %c1_25 = arith.constant 1 : index
    %c0_26 = arith.constant 0 : index
    %c0_27 = arith.constant 0 : index
    %82 = vector.load %arg4[%c1_25, %c0_26, %c0_27] : memref<4x96x32xbf16, #tpu.memory_space<vmem>>, vector<1x96x32xbf16>
    %83 = vector.shape_cast %82 : vector<1x96x32xbf16> to vector<96x32xbf16>
    %cst_28 = arith.constant dense<0.000000e+00> : vector<8x32xf32>
    %84 = tpu.matmul %81, %83, %cst_28 {dimension_numbers = #tpu.dot_dimension_numbers<[1], [0], [0], [1], [0, 0, 1, 1], [], []>} : vector<8x96xbf16>, vector<96x32xbf16>, vector<8x32xf32> -> vector<8x32xf32>
    %c1_29 = arith.constant 1 : index
    %c0_30 = arith.constant 0 : index
    %c0_31 = arith.constant 0 : index
    %85 = vector.load %arg5[%c1_29, %c0_30, %c0_31] : memref<4x1x32xf32, #tpu.memory_space<vmem>>, vector<1x1x32xf32>
    %86 = vector.shape_cast %85 : vector<1x1x32xf32> to vector<1x32xf32>
    %87 = vector.broadcast %86 : vector<1x32xf32> to vector<8x32xf32>
    %88 = arith.addf %84, %87 : vector<8x32xf32>
    %89 = vector.shape_cast %88 : vector<8x32xf32> to vector<1x8x32xf32>
    %90 = math.tanh %89 : vector<1x8x32xf32>
    %91 = math.exp %90 : vector<1x8x32xf32>
    %92 = arith.mulf %1, %91 : vector<1x8x32xf32>
    %93 = vector.extract_strided_slice %47 {offsets = [0, 0, 0], sizes = [1, 1, 32], strides = [1, 1, 1]} : vector<1x8x32xf32> to vector<1x1x32xf32>
    %94 = vector.shape_cast %93 : vector<1x1x32xf32> to vector<1x1x32xf32>
    %95 = vector.broadcast %94 : vector<1x1x32xf32> to vector<1x3x32xf32>
    %96 = vector.extract_strided_slice %47 {offsets = [0, 7, 0], sizes = [1, 1, 32], strides = [1, 1, 1]} : vector<1x8x32xf32> to vector<1x1x32xf32>
    %97 = vector.shape_cast %96 : vector<1x1x32xf32> to vector<1x1x32xf32>
    %98 = vector.broadcast %97 : vector<1x1x32xf32> to vector<1x3x32xf32>
    %99 = tpu.concatenate %95, %47, %98 in 1 : vector<1x3x32xf32>, vector<1x8x32xf32>, vector<1x3x32xf32> -> vector<1x14x32xf32>
    %100 = vector.extract_strided_slice %99 {offsets = [0, 0, 0], sizes = [1, 10, 32], strides = [1, 1, 1]} : vector<1x14x32xf32> to vector<1x10x32xf32>
    %101 = vector.extract_strided_slice %99 {offsets = [0, 1, 0], sizes = [1, 10, 32], strides = [1, 1, 1]} : vector<1x14x32xf32> to vector<1x10x32xf32>
    %102 = vector.extract_strided_slice %99 {offsets = [0, 2, 0], sizes = [1, 10, 32], strides = [1, 1, 1]} : vector<1x14x32xf32> to vector<1x10x32xf32>
    %103 = vector.extract_strided_slice %99 {offsets = [0, 3, 0], sizes = [1, 10, 32], strides = [1, 1, 1]} : vector<1x14x32xf32> to vector<1x10x32xf32>
    %104 = vector.extract_strided_slice %99 {offsets = [0, 4, 0], sizes = [1, 10, 32], strides = [1, 1, 1]} : vector<1x14x32xf32> to vector<1x10x32xf32>
    %105 = tpu.concatenate %100, %101, %102, %103, %104 in 2 : vector<1x10x32xf32>, vector<1x10x32xf32>, vector<1x10x32xf32>, vector<1x10x32xf32>, vector<1x10x32xf32> -> vector<1x10x160xf32>
    %106 = vector.shape_cast %105 : vector<1x10x160xf32> to vector<10x160xf32>
    %107 = arith.truncf %106 : vector<10x160xf32> to vector<10x160xbf16>
    %c2 = arith.constant 2 : index
    %c0_32 = arith.constant 0 : index
    %c0_33 = arith.constant 0 : index
    %108 = vector.load %arg2[%c2, %c0_32, %c0_33] : memref<4x160x32xbf16, #tpu.memory_space<vmem>>, vector<1x160x32xbf16>
    %109 = vector.shape_cast %108 : vector<1x160x32xbf16> to vector<160x32xbf16>
    %cst_34 = arith.constant dense<0.000000e+00> : vector<10x32xf32>
    %110 = tpu.matmul %107, %109, %cst_34 {dimension_numbers = #tpu.dot_dimension_numbers<[1], [0], [0], [1], [0, 0, 1, 1], [], []>} : vector<10x160xbf16>, vector<160x32xbf16>, vector<10x32xf32> -> vector<10x32xf32>
    %c2_35 = arith.constant 2 : index
    %c0_36 = arith.constant 0 : index
    %c0_37 = arith.constant 0 : index
    %111 = vector.load %arg3[%c2_35, %c0_36, %c0_37] : memref<4x1x32xf32, #tpu.memory_space<vmem>>, vector<1x1x32xf32>
    %112 = vector.shape_cast %111 : vector<1x1x32xf32> to vector<1x32xf32>
    %113 = vector.broadcast %112 : vector<1x32xf32> to vector<10x32xf32>
    %114 = arith.addf %110, %113 : vector<10x32xf32>
    %115 = vector.shape_cast %114 : vector<10x32xf32> to vector<1x10x32xf32>
    %cst_38 = arith.constant 0.000000e+00 : f32
    %116 = vector.broadcast %cst_38 : f32 to vector<1x10x32xf32>
    %117 = arith.cmpf oge, %115, %116 : vector<1x10x32xf32>
    %cst_39 = arith.constant 0.00999999977 : f32
    %118 = vector.broadcast %cst_39 : f32 to vector<1x10x32xf32>
    %119 = arith.mulf %118, %115 : vector<1x10x32xf32>
    %120 = arith.select %117, %115, %119 : vector<1x10x32xi1>, vector<1x10x32xf32>
    %121 = vector.extract_strided_slice %120 {offsets = [0, 0, 0], sizes = [1, 8, 32], strides = [1, 1, 1]} : vector<1x10x32xf32> to vector<1x8x32xf32>
    %122 = vector.extract_strided_slice %120 {offsets = [0, 1, 0], sizes = [1, 8, 32], strides = [1, 1, 1]} : vector<1x10x32xf32> to vector<1x8x32xf32>
    %123 = vector.extract_strided_slice %120 {offsets = [0, 2, 0], sizes = [1, 8, 32], strides = [1, 1, 1]} : vector<1x10x32xf32> to vector<1x8x32xf32>
    %124 = tpu.concatenate %121, %122, %123 in 2 : vector<1x8x32xf32>, vector<1x8x32xf32>, vector<1x8x32xf32> -> vector<1x8x96xf32>
    %125 = vector.shape_cast %124 : vector<1x8x96xf32> to vector<8x96xf32>
    %126 = arith.truncf %125 : vector<8x96xf32> to vector<8x96xbf16>
    %c2_40 = arith.constant 2 : index
    %c0_41 = arith.constant 0 : index
    %c0_42 = arith.constant 0 : index
    %127 = vector.load %arg4[%c2_40, %c0_41, %c0_42] : memref<4x96x32xbf16, #tpu.memory_space<vmem>>, vector<1x96x32xbf16>
    %128 = vector.shape_cast %127 : vector<1x96x32xbf16> to vector<96x32xbf16>
    %cst_43 = arith.constant dense<0.000000e+00> : vector<8x32xf32>
    %129 = tpu.matmul %126, %128, %cst_43 {dimension_numbers = #tpu.dot_dimension_numbers<[1], [0], [0], [1], [0, 0, 1, 1], [], []>} : vector<8x96xbf16>, vector<96x32xbf16>, vector<8x32xf32> -> vector<8x32xf32>
    %c2_44 = arith.constant 2 : index
    %c0_45 = arith.constant 0 : index
    %c0_46 = arith.constant 0 : index
    %130 = vector.load %arg5[%c2_44, %c0_45, %c0_46] : memref<4x1x32xf32, #tpu.memory_space<vmem>>, vector<1x1x32xf32>
    %131 = vector.shape_cast %130 : vector<1x1x32xf32> to vector<1x32xf32>
    %132 = vector.broadcast %131 : vector<1x32xf32> to vector<8x32xf32>
    %133 = arith.addf %129, %132 : vector<8x32xf32>
    %134 = vector.shape_cast %133 : vector<8x32xf32> to vector<1x8x32xf32>
    %135 = math.tanh %134 : vector<1x8x32xf32>
    %136 = arith.addf %92, %135 : vector<1x8x32xf32>
    %137 = vector.extract_strided_slice %92 {offsets = [0, 0, 0], sizes = [1, 1, 32], strides = [1, 1, 1]} : vector<1x8x32xf32> to vector<1x1x32xf32>
    %138 = vector.shape_cast %137 : vector<1x1x32xf32> to vector<1x1x32xf32>
    %139 = vector.broadcast %138 : vector<1x1x32xf32> to vector<1x3x32xf32>
    %140 = vector.extract_strided_slice %92 {offsets = [0, 7, 0], sizes = [1, 1, 32], strides = [1, 1, 1]} : vector<1x8x32xf32> to vector<1x1x32xf32>
    %141 = vector.shape_cast %140 : vector<1x1x32xf32> to vector<1x1x32xf32>
    %142 = vector.broadcast %141 : vector<1x1x32xf32> to vector<1x3x32xf32>
    %143 = tpu.concatenate %139, %92, %142 in 1 : vector<1x3x32xf32>, vector<1x8x32xf32>, vector<1x3x32xf32> -> vector<1x14x32xf32>
    %144 = vector.extract_strided_slice %143 {offsets = [0, 0, 0], sizes = [1, 10, 32], strides = [1, 1, 1]} : vector<1x14x32xf32> to vector<1x10x32xf32>
    %145 = vector.extract_strided_slice %143 {offsets = [0, 1, 0], sizes = [1, 10, 32], strides = [1, 1, 1]} : vector<1x14x32xf32> to vector<1x10x32xf32>
    %146 = vector.extract_strided_slice %143 {offsets = [0, 2, 0], sizes = [1, 10, 32], strides = [1, 1, 1]} : vector<1x14x32xf32> to vector<1x10x32xf32>
    %147 = vector.extract_strided_slice %143 {offsets = [0, 3, 0], sizes = [1, 10, 32], strides = [1, 1, 1]} : vector<1x14x32xf32> to vector<1x10x32xf32>
    %148 = vector.extract_strided_slice %143 {offsets = [0, 4, 0], sizes = [1, 10, 32], strides = [1, 1, 1]} : vector<1x14x32xf32> to vector<1x10x32xf32>
    %149 = tpu.concatenate %144, %145, %146, %147, %148 in 2 : vector<1x10x32xf32>, vector<1x10x32xf32>, vector<1x10x32xf32>, vector<1x10x32xf32>, vector<1x10x32xf32> -> vector<1x10x160xf32>
    %150 = vector.shape_cast %149 : vector<1x10x160xf32> to vector<10x160xf32>
    %151 = arith.truncf %150 : vector<10x160xf32> to vector<10x160xbf16>
    %c3 = arith.constant 3 : index
    %c0_47 = arith.constant 0 : index
    %c0_48 = arith.constant 0 : index
    %152 = vector.load %arg2[%c3, %c0_47, %c0_48] : memref<4x160x32xbf16, #tpu.memory_space<vmem>>, vector<1x160x32xbf16>
    %153 = vector.shape_cast %152 : vector<1x160x32xbf16> to vector<160x32xbf16>
    %cst_49 = arith.constant dense<0.000000e+00> : vector<10x32xf32>
    %154 = tpu.matmul %151, %153, %cst_49 {dimension_numbers = #tpu.dot_dimension_numbers<[1], [0], [0], [1], [0, 0, 1, 1], [], []>} : vector<10x160xbf16>, vector<160x32xbf16>, vector<10x32xf32> -> vector<10x32xf32>
    %c3_50 = arith.constant 3 : index
    %c0_51 = arith.constant 0 : index
    %c0_52 = arith.constant 0 : index
    %155 = vector.load %arg3[%c3_50, %c0_51, %c0_52] : memref<4x1x32xf32, #tpu.memory_space<vmem>>, vector<1x1x32xf32>
    %156 = vector.shape_cast %155 : vector<1x1x32xf32> to vector<1x32xf32>
    %157 = vector.broadcast %156 : vector<1x32xf32> to vector<10x32xf32>
    %158 = arith.addf %154, %157 : vector<10x32xf32>
    %159 = vector.shape_cast %158 : vector<10x32xf32> to vector<1x10x32xf32>
    %cst_53 = arith.constant 0.000000e+00 : f32
    %160 = vector.broadcast %cst_53 : f32 to vector<1x10x32xf32>
    %161 = arith.cmpf oge, %159, %160 : vector<1x10x32xf32>
    %cst_54 = arith.constant 0.00999999977 : f32
    %162 = vector.broadcast %cst_54 : f32 to vector<1x10x32xf32>
    %163 = arith.mulf %162, %159 : vector<1x10x32xf32>
    %164 = arith.select %161, %159, %163 : vector<1x10x32xi1>, vector<1x10x32xf32>
    %165 = vector.extract_strided_slice %164 {offsets = [0, 0, 0], sizes = [1, 8, 32], strides = [1, 1, 1]} : vector<1x10x32xf32> to vector<1x8x32xf32>
    %166 = vector.extract_strided_slice %164 {offsets = [0, 1, 0], sizes = [1, 8, 32], strides = [1, 1, 1]} : vector<1x10x32xf32> to vector<1x8x32xf32>
    %167 = vector.extract_strided_slice %164 {offsets = [0, 2, 0], sizes = [1, 8, 32], strides = [1, 1, 1]} : vector<1x10x32xf32> to vector<1x8x32xf32>
    %168 = tpu.concatenate %165, %166, %167 in 2 : vector<1x8x32xf32>, vector<1x8x32xf32>, vector<1x8x32xf32> -> vector<1x8x96xf32>
    %169 = vector.shape_cast %168 : vector<1x8x96xf32> to vector<8x96xf32>
    %170 = arith.truncf %169 : vector<8x96xf32> to vector<8x96xbf16>
    %c3_55 = arith.constant 3 : index
    %c0_56 = arith.constant 0 : index
    %c0_57 = arith.constant 0 : index
    %171 = vector.load %arg4[%c3_55, %c0_56, %c0_57] : memref<4x96x32xbf16, #tpu.memory_space<vmem>>, vector<1x96x32xbf16>
    %172 = vector.shape_cast %171 : vector<1x96x32xbf16> to vector<96x32xbf16>
    %cst_58 = arith.constant dense<0.000000e+00> : vector<8x32xf32>
    %173 = tpu.matmul %170, %172, %cst_58 {dimension_numbers = #tpu.dot_dimension_numbers<[1], [0], [0], [1], [0, 0, 1, 1], [], []>} : vector<8x96xbf16>, vector<96x32xbf16>, vector<8x32xf32> -> vector<8x32xf32>
    %c3_59 = arith.constant 3 : index
    %c0_60 = arith.constant 0 : index
    %c0_61 = arith.constant 0 : index
    %174 = vector.load %arg5[%c3_59, %c0_60, %c0_61] : memref<4x1x32xf32, #tpu.memory_space<vmem>>, vector<1x1x32xf32>
    %175 = vector.shape_cast %174 : vector<1x1x32xf32> to vector<1x32xf32>
    %176 = vector.broadcast %175 : vector<1x32xf32> to vector<8x32xf32>
    %177 = arith.addf %173, %176 : vector<8x32xf32>
    %178 = vector.shape_cast %177 : vector<8x32xf32> to vector<1x8x32xf32>
    %179 = math.tanh %178 : vector<1x8x32xf32>
    %180 = arith.subf %47, %179 : vector<1x8x32xf32>
    %181 = tpu.transpose %136, [0, 2, 1] : vector<1x8x32xf32> -> vector<1x32x8xf32>
    %c0_62 = arith.constant 0 : index
    %c0_63 = arith.constant 0 : index
    %c0_64 = arith.constant 0 : index
    %182 = vector.load %arg6[%c0_62, %c0_63, %c0_64] : memref<1x32x8xf32, #tpu.memory_space<vmem>>, vector<1x32x8xf32>
    tpu.vector_store %arg6[%c0_62, %c0_63, %c0_64], %181 {strides = array<i32>} : memref<1x32x8xf32, #tpu.memory_space<vmem>>, vector<1x32x8xf32>,
    %183 = tpu.transpose %180, [0, 2, 1] : vector<1x8x32xf32> -> vector<1x32x8xf32>
    %c0_65 = arith.constant 0 : index
    %c0_66 = arith.constant 0 : index
    %c0_67 = arith.constant 0 : index
    %184 = vector.load %arg7[%c0_65, %c0_66, %c0_67] : memref<1x32x8xf32, #tpu.memory_space<vmem>>, vector<1x32x8xf32>
    tpu.vector_store %arg7[%c0_65, %c0_66, %c0_67], %183 {strides = array<i32>} : memref<1x32x8xf32, #tpu.memory_space<vmem>>, vector<1x32x8xf32>,
    return
  }
  func.func @transform_0(%arg0: i32) -> (i32, i32, i32) {
    %c0_i32 = arith.constant 0 : i32
    %c0_i32_0 = arith.constant 0 : i32
    %c0_i32_1 = arith.constant 0 : i32
    return %arg0, %c0_i32, %c0_i32_0 : i32, i32, i32
  }
  func.func @transform_1(%arg0: i32) -> (i32, i32, i32) {
    %c0_i32 = arith.constant 0 : i32
    %c0_i32_0 = arith.constant 0 : i32
    %c0_i32_1 = arith.constant 0 : i32
    %c0_i32_2 = arith.constant 0 : i32
    return %c0_i32, %c0_i32_0, %c0_i32_1 : i32, i32, i32
  }
  func.func @transform_2(%arg0: i32) -> (i32, i32, i32) {
    %c0_i32 = arith.constant 0 : i32
    %c0_i32_0 = arith.constant 0 : i32
    %c0_i32_1 = arith.constant 0 : i32
    %c0_i32_2 = arith.constant 0 : i32
    return %c0_i32, %c0_i32_0, %c0_i32_1 : i32, i32, i32
  }
  func.func @transform_3(%arg0: i32) -> (i32, i32, i32) {
    %c0_i32 = arith.constant 0 : i32
    %c0_i32_0 = arith.constant 0 : i32
    %c0_i32_1 = arith.constant 0 : i32
    %c0_i32_2 = arith.constant 0 : i32
    return %c0_i32, %c0_i32_0, %c0_i32_1 : i32, i32, i32
  }
  func.func @transform_4(%arg0: i32) -> (i32, i32, i32) {
    %c0_i32 = arith.constant 0 : i32
    %c0_i32_0 = arith.constant 0 : i32
    %c0_i32_1 = arith.constant 0 : i32
    %c0_i32_2 = arith.constant 0 : i32
    return %c0_i32, %c0_i32_0, %c0_i32_1 : i32, i32, i32
  }
  func.func @transform_5(%arg0: i32) -> (i32, i32, i32) {
    %c0_i32 = arith.constant 0 : i32
    %c0_i32_0 = arith.constant 0 : i32
    %c0_i32_1 = arith.constant 0 : i32
    return %arg0, %c0_i32, %c0_i32_0 : i32, i32, i32
  }
  func.func @transform_6(%arg0: i32) -> (i32, i32, i32) {
    %c0_i32 = arith.constant 0 : i32
    %c0_i32_0 = arith.constant 0 : i32
    %c0_i32_1 = arith.constant 0 : i32
    return %arg0, %c0_i32, %c0_i32_0 : i32, i32, i32
  }
}

</mosaic_0001>

<bundles_post_ra>
// kernel: tpu_custom_call.1
= control target key start
LH: loop header
LB: loop body
LE: loop exit
PB: predicated region body
PF: predicated region fallthrough
CT: control target
= control target key end

     0   :  { %s2179_s21 = smov 0   ;;  %s2685_s0 = inlined_call_operand.vmem [shape: f32[2,8,64], index: 0, kind: input, shape index: {}]   ;;  %s2686_s1 = inlined_call_operand.vmem [shape: bf16[4,160,32], index: 1, kind: input, shape index: {}]   ;;  %s2687_s2 = inlined_call_operand.vmem [shape: f32[4,1,32], index: 2, kind: input, shape index: {}]   ;;  %s2688_s3 = inlined_call_operand.vmem [shape: bf16[4,96,32], index: 3, kind: input, shape index: {}]   ;;  %s2689_s4 = inlined_call_operand.vmem [shape: f32[4,1,32], index: 4, kind: input, shape index: {}]   ;;  %s2690_s5 = inlined_call_operand.vmem [shape: f32[2,32,8], index: 5, kind: output, shape index: {0}]   ;;  %s2691_s6 = inlined_call_operand.vmem [shape: f32[2,32,8], index: 6, kind: output, shape index: {1}]  }
   0x1 LB: > { %s1682_s22 = sadd.s32 4294967295, %s2136_s21   ;;  %p1686_p0 = scmp.ge.s32.totalorder %s2136_s21, 1  ;;  %s2136_s21 = sphi %s2179_s21, %s17_s21  }
   0x2   : > { %p214_p1 = scmp.lt.s32.totalorder %s2136_s21, 3 }
   0x4   : > { %p215_p2 = pnand %p1686_p0, %p214_p1 }
   0x5   : > { %p248_p3 = scmp.lt.s32.totalorder (!%p215_p2), %s1682_s22, 1  ;;  %s2139_s13 = smov (!%p215_p2), 32  }
   0x6   : > { %218 = sbr.rel (%p215_p2) target bundleno = 2215 (0x8a7), region = 40  ;;  %s2140_s14 = smov (!%p215_p2), 96  }
   0x7   : > { %s2141_s17 = smov (!%p215_p2), 64  }
   0xb   : > { %v264_v0 = vlaneseq  ;;  %v2054_v1 = vld [vmem:[%s2686_s1 + $0x38] sm:$0xff]   ;;  %s2693_s22 = smov (!%p248_p3, %s1682_s22), 1  ;;  %v2138_v3 = vmov 0   ;;  %v2055_v4 = vld [vmem:[%s2686_s1 + $0x30] sm:$0xff]   ;;  %vm275_vm0 = vcmask 1042432   ;;  %v2056_v11 = vld [vmem:[%s2686_s1 + $0x28] sm:$0xff]  }
   0xc   : > { %417 = vmatprep.subr.bf16.mxu0 %v2138_v3  ;;  %s1687_s27 = sshll.u32 %s2693_s22, 3  ;;  %vm280_vm1 = vcmask 1046528   ;;  %vm290_vm2 = vcmask 1045504   ;;  %vm300_vm3 = vcmask 1044480   ;;  %v2057_v18 = vld [vmem:[%s2686_s1 + $0x20] sm:$0xff]   ;;  %vm310_vm4 = vcmask 1043456  }
   0xd   : > { %v265_v2 = vshrl.u32 %v264_v0, 7  ;;  %418 = vmatpush1.bf16.msra.mxu0 %v2054_v1  ;;  %s251_s30 = scalar_lea.vmem %s2685_s0, %s1687_s27  ;;  %v2058_v26 = vld [vmem:[%s2686_s1 + $0x18] sm:$0xff]   ;;  %vm316_vm5 = vcmask 261120   ;;  %v2059_v33 = vld [vmem:[%s2686_s1 + $0x10] sm:$0xff]   ;;  %v2060_v34 = vld [vmem:[%s2686_s1 + $0x8] sm:$0xff]   ;;  %vm319_vm6 = vcmask 523264  }
   0xe   : > { %419 = vmatprep.subr.bf16.mxu0 %v2138_v3  ;;  %v2205_v7 = vld [vmem:[%s251_s30] sm:$0xff]  ;;  %v2062_v36 = vld [vmem:[%s2686_s1 + $0x48] sm:$0xff]   ;;  %vm322_vm7 = vcmask 785408   ;;  %v2142_v55 = vmov 0.0   ;;  %v2066_v57 = vld [vmem:[%s2688_s3 + $0x18] sm:$0xff]   ;;  %vm2143_vm8 = vmmov 0  }
   0xf   : > { %v2197_v5 = vsub.s32 0, %v265_v2  ;;  %v2199_v6 = vsub.s32 7, %v265_v2  ;;  %v273_v10 = vrot.slane %v2205_v7, 5  ;;  %v2061_v35 = vld [vmem:[%s2686_s1] sm:$0xff]   ;;  %v2064_v54 = vld [vmem:[%s2688_s3 + $0x28] sm:$0xff]   ;;  %1906 = vmatprep.subr.bf16.mxu1 %v2142_v55  ;;  %v2067_v58 = vld [vmem:[%s2688_s3 + $0x10] sm:$0xff]   ;;  %1918 = vmatprep.mubr.msk.bf16.mxu1 %vm2143_vm8, %v2142_v55 }
  0x10   : > { %v2063_v37 = vld [vmem:[%s2686_s1 + $0x40] sm:$0xff]   ;;  %1907 = vmatpush3.bf16.msra.mxu1 %v2064_v54  ;;  %v2068_v59 = vld [vmem:[%s2688_s3 + $0x8] sm:$0xff]   ;;  %s1876_s15 = sshll.u32 %s2693_s22, 5 }
  0x11   : > { %v267_v8 = vrot.slane %v2205_v7, %v2197_v5  ;;  %v271_v9 = vrot.slane %v2205_v7, %v2199_v6  ;;  %420 = vmatpush1.bf16.msra.mxu0 %v2055_v4  ;;  %v2065_v56 = vld [vmem:[%s2688_s3 + $0x20] sm:$0xff]   ;;  %1908 = vmatprep.subr.bf16.mxu1 %v2142_v55  ;;  %s261_s19 = scalar_lea.vmem %s2691_s6, %s1876_s15 }
  0x12   : > { %421 = vmatprep.subr.bf16.mxu0 %v2138_v3  ;;  %v1692_v60 = vld [vmem:[%s2687_s2] ss:$0 sm:$0xff] }
  0x13   : > { %v2217_v12 = vsel %vm275_vm0, %v267_v8, %v273_v10  ;;  %v2220_v13 = vsel %vm275_vm0, %v273_v10, %v271_v9  ;;  %v2069_v61 = vld [vmem:[%s2688_s3] sm:$0xff]  }
  0x14   : > { %v281_v14 = vrot.slane %v2217_v12, 1  ;;  %v2224_v15 = vrot.slane %v2220_v13, 1  ;;  %v291_v16 = vrot.slane %v2217_v12, 2  ;;  %v292_v17 = vrot.slane %v2220_v13, 2  ;;  %1909 = vmatpush3.bf16.msra.mxu1 %v2065_v56  ;;  %v1704_v54 = vld [vmem:[%s2689_s4] ss:$0 sm:$0xff] }
  0x15   : > { %v301_v19 = vrot.slane %v2217_v12, 3  ;;  %v302_v20 = vrot.slane %v2220_v13, 3  ;;  %422 = vmatpush1.bf16.msra.mxu0 %v2056_v11  ;;  %v311_v23 = vrot.slane %v2217_v12, 4  ;;  %v2247_v27 = vrot.slane %v2220_v13, 4  ;;  %1910 = vmatprep.subr.bf16.mxu1 %v2142_v55 }
  0x16   : > { %v2235_v21 = vsel %vm280_vm1, %v281_v14, %v2224_v15  ;;  %v293_v22 = vsel %vm290_vm2, %v291_v16, %v292_v17  ;;  %423 = vmatprep.subr.bf16.mxu0 %v2138_v3 }
  0x17   : > { %v1984_v24 = vpack.i.bf16 %v2224_v15, %v2235_v21  ;;  %v303_v25 = vsel %vm300_vm3, %v301_v19, %v302_v20  ;;  %v2252_v29 = vpack.i.bf16 %v292_v17, %v293_v22  ;;  %v2256_v30 = vsel %vm310_vm4, %v311_v23, %v2247_v27 }
  0x18   : > { %v2249_v28 = vpack.i.bf16 %v302_v20, %v303_v25  ;;  %v2014_v31 = vpack.i.bf16 %v2247_v27, %v2256_v30  ;;  %v326_v32 = vpack.c.bf16 %v2247_v27, %v2256_v30  ;;  %1911 = vmatpush3.bf16.msra.mxu1 %v2066_v57  ;;  %v1999_v22 = vpack.i.bf16 %v2220_v13, %v2217_v12  ;;  %v2071_v27 = vld [vmem:[%s2686_s1 + $0x80] sm:$0xff]  }
  0x19   : > { %1985 = vrot.lane.b32.xlu0 %v1984_v24, %s2139_s13  ;;  %424 = vmatpush1.bf16.msra.mxu0 %v2057_v18 }
  0x1a   : > { %1995 = vrot.lane.b32.xlu1 %v2249_v28, %s2140_s14  ;;  %425 = vmatprep.subr.bf16.mxu0 %v2138_v3 }
  0x1b   : > { %1703 = vmatprep.mubr.msk.bf16.mxu0 %vm316_vm5, %v326_v32  ;;  %1912 = vmatprep.subr.bf16.mxu1 %v2142_v55  ;;  %v2072_v32 = vld [vmem:[%s2686_s1 + $0x78] sm:$0xff]  }
  0x1c   : > { %1913 = vmatpush3.bf16.msra.mxu1 %v2067_v58 }
  0x1d   : > { %1990 = vrot.lane.b32.xlu0 %v2252_v29, %s2141_s17  ;;  %426 = vmatpush1.bf16.msra.mxu0 %v2058_v26 }
  0x1e   : > { %427 = vmatprep.subr.bf16.mxu0 %v2138_v3  ;;  %1914 = vmatprep.subr.bf16.mxu1 %v2142_v55 }
  0x20   : > { %1915 = vmatpush3.bf16.msra.mxu1 %v2068_v59 }
  0x21   : > { %428 = vmatpush1.bf16.msra.mxu0 %v2059_v33  ;;  %1916 = vmatprep.subr.bf16.mxu1 %v2142_v55 }
  0x22   : > { %429 = vmatprep.subr.bf16.mxu0 %v2138_v3 }
  0x24   : > { %1917 = vmatpush3.bf16.msra.mxu1 %v2069_v61 }
  0x25   : > { %430 = vmatpush1.bf16.msra.mxu0 %v2060_v34  ;;  %713 = vmatprep.subr.bf16.mxu1 %v2138_v3  ;;  %v2073_v34 = vld [vmem:[%s2686_s1 + $0x70] sm:$0xff]  }
  0x26   : > { %431 = vmatprep.subr.bf16.mxu0 %v2138_v3 }
  0x29   : > { %432 = vmatpush1.bf16.msra.mxu0 %v2061_v35  ;;  %v2074_v35 = vld [vmem:[%s2686_s1 + $0x68] sm:$0xff]  }
  0x2a   : > { %445 = vmatprep.subr.bf16.mxu0 %v2138_v3 }
  0x2d   : > { %446 = vmatpush2.bf16.msra.mxu0 %v2062_v36  ;;  %v2075_v36 = vld [vmem:[%s2686_s1 + $0x60] sm:$0xff]  }
  0x2e   : > { %447 = vmatprep.subr.bf16.mxu0 %v2138_v3 }
  0x31   : > { %448 = vmatpush2.bf16.msra.mxu0 %v2063_v37 }
  0x32   : > { %1922 = vmatprep.subr.bf16.mxu0 %v2142_v55 }
  0x8b   : > { %v1986_v38 = vpop.permute.xlu0 %1985 }
  0x8c   : > { %v1996_v39 = vpop.permute.xlu1 %1995  ;;  %v1988_v40 = vunpack.i.h.bf16 %v1986_v38  ;;  %v1987_v41 = vunpack.i.l.bf16 %v1986_v38  ;;  %v2076_v38 = vld [vmem:[%s2686_s1 + $0x58] sm:$0xff]  }
  0x8d   : > { %v1998_v43 = vunpack.i.h.bf16 %v1996_v39  ;;  %v1997_v44 = vunpack.i.l.bf16 %v1996_v39 }
  0x8e   : > { %v318_v47 = vsel %vm316_vm5, %v2220_v13, %v1988_v40  ;;  %v317_v48 = vsel %vm316_vm5, %v2217_v12, %v1987_v41  ;;  %v2070_v12 = vld [vmem:[%s2686_s1 + $0x88] sm:$0xff]   ;;  %v2077_v41 = vld [vmem:[%s2686_s1 + $0x50] sm:$0xff]  }
  0x8f   : > { %v1991_v42 = vpop.permute.xlu0 %1990 }
  0x90   : > { %v1993_v45 = vunpack.i.h.bf16 %v1991_v42  ;;  %v1992_v46 = vunpack.i.l.bf16 %v1991_v42 }
  0x92   : > { %v320_v49 = vsel %vm319_vm6, %v317_v48, %v1992_v46  ;;  %v321_v50 = vsel %vm319_vm6, %v318_v47, %v1993_v45  ;;  %v2078_v47 = vld [vmem:[%s2686_s1 + $0x98] sm:$0xff]  }
  0x93   : > { %v323_v51 = vsel %vm322_vm7, %v320_v49, %v1997_v44  ;;  %v324_v52 = vsel %vm322_vm7, %v321_v50, %v1998_v43 }
  0x94   : > { %v325_v53 = vpack.c.bf16 %v324_v52, %v323_v51 }
  0x96   : > { %450 = vmatmul.mubr.bf16.vlgmr.msra.gmra.mxu0 %v325_v53 }
  0x97   : > { %1934 = vmatprep.mubr.msk.bf16.mxu0 %vm2143_vm8, %v2142_v55 }
 0x156   : > { %v451_v62 = vpop.f32.mrf.mxu0 }
 0x157   : > { %v452_v63 = vadd.f32 %v1692_v60, %v451_v62 }
 0x158   : > { %v453_v0 = vpop.f32.mrf.mxu0 }
 0x159   : > { %v460_v1 = vmul.f32 0.01, %v452_v63  ;;  %vm458_vm9 = vcmp.ge.f32.partialorder %v452_v63, 0.0  ;;  %v2081_v0 = vld [vmem:[%s2688_s3 + $0x50] sm:$0xff]  }
 0x15a   : > { %v454_v2 = vpop.f32.mrf.mxu0 }
 0x15b   : > { %v455_v4 = vadd.f32 %v1692_v60, %v454_v2  ;;  %v462_v9 = vsel %vm458_vm9, %v452_v63, %v460_v1  ;;  %v2080_v63 = vld [vmem:[%s2688_s3 + $0x58] sm:$0xff]   ;;  %v2082_v1 = vld [vmem:[%s2688_s3 + $0x48] sm:$0xff]   ;;  %v2083_v2 = vld [vmem:[%s2688_s3 + $0x40] sm:$0xff]  }
 0x15c   : > { %v456_v8 = vpop.f32.mrf.mxu0  ;;  %v472_v17 = vrot.slane %v462_v9, 2  ;;  %v466_v18 = vrot.slane %v462_v9, 1  ;;  %1923 = vmatpush3.bf16.msra.mxu0 %v2080_v63  ;;  %v2093_v63 = vld [vmem:[%s2686_s1 + $0xa0] sm:$0xff]  }
 0x15d   : > { %vm459_vm10 = vcmp.ge.f32.partialorder %v455_v4, 0.0  ;;  %v461_v10 = vmul.f32 0.01, %v455_v4  ;;  %1924 = vmatprep.subr.bf16.mxu0 %v2142_v55  ;;  %v2084_v8 = vld [vmem:[%s2688_s3 + $0x38] sm:$0xff]  }
 0x15f   : > { %v463_v11 = vsel %vm459_vm10, %v455_v4, %v461_v10  ;;  %v2085_v10 = vld [vmem:[%s2688_s3 + $0x30] sm:$0xff]  }
 0x160   : > { %v467_v14 = vrot.slane %v463_v11, 1  ;;  %v473_v16 = vrot.slane %v463_v11, 2  ;;  %1925 = vmatpush3.bf16.msra.mxu0 %v2081_v0  ;;  %v2094_v0 = vld [vmem:[%s2686_s1 + $0xe8] sm:$0xff]  }
 0x161   : > { %1926 = vmatprep.subr.bf16.mxu0 %v2142_v55 }
 0x162   : > { %v474_v19 = vsel %vm290_vm2, %v472_v17, %v473_v16  ;;  %v468_v20 = vsel %vm280_vm1, %v466_v18, %v467_v14 }
 0x163   : > { %475 = vrot.lane.b32.xlu0 %v474_v19, %s2141_s17  ;;  %469 = vrot.lane.b32.xlu1 %v468_v20, %s2139_s13 }
 0x164   : > { %1927 = vmatpush3.bf16.msra.mxu0 %v2082_v1  ;;  %v2095_v1 = vld [vmem:[%s2686_s1 + $0xe0] sm:$0xff]  }
 0x165   : > { %1928 = vmatprep.subr.bf16.mxu0 %v2142_v55 }
 0x167   : > { %2005 = vrot.lane.b32.xlu0 %v2252_v29, %s2139_s13  ;;  %2000 = vrot.lane.b32.xlu1 %v1999_v22, %s2140_s14 }
 0x168   : > { %1929 = vmatpush3.bf16.msra.mxu0 %v2083_v2 }
 0x169   : > { %1930 = vmatprep.subr.bf16.mxu0 %v2142_v55 }
 0x16b   : > { %2015 = vrot.lane.b32.xlu0 %v2014_v31, %s2140_s14  ;;  %2010 = vrot.lane.b32.xlu1 %v2249_v28, %s2141_s17 }
 0x16c   : > { %1931 = vmatpush3.bf16.msra.mxu0 %v2084_v8 }
 0x16d   : > { %1932 = vmatprep.subr.bf16.mxu0 %v2142_v55 }
 0x170   : > { %1933 = vmatpush3.bf16.msra.mxu0 %v2085_v10 }
 0x171   : > { %1034 = vmatprep.subr.bf16.mxu0 %v2138_v3 }
 0x1d5   : > { %v476_v23 = vpop.permute.xlu0 %475  ;;  %v470_v24 = vpop.permute.xlu1 %469 }
 0x1d6   : > { %v478_v25 = vsel %vm316_vm5, %v462_v9, %v470_v24  ;;  %v1733_v9 = vld [vmem:[%s2687_s2 + $0x1] ss:$0 sm:$0xff] }
 0x1d7   : > { %v479_v26 = vsel %vm319_vm6, %v478_v25, %v476_v23 }
 0x1d8   : > { %v480_v13 = vpack.c.bf16 %v479_v26, %v479_v26 }
 0x1d9   : > { %v2006_v29 = vpop.permute.xlu0 %2005  ;;  %v2001_v37 = vpop.permute.xlu1 %2000 }
 0x1da   : > { %1919 = vmatmul.mubr.msk.bf16.vlgmr.msra.gmra.mxu1 %vm322_vm7, %v480_v13  ;;  %v2003_v39 = vunpack.i.h.bf16 %v2001_v37  ;;  %v2002_v40 = vunpack.i.l.bf16 %v2001_v37  ;;  %v2008_v42 = vunpack.i.h.bf16 %v2006_v29  ;;  %v2007_v43 = vunpack.i.l.bf16 %v2006_v29 }
 0x1db   : > { %714 = vmatpush1.bf16.msra.mxu1 %v2070_v12 }
 0x1dc   : > { %715 = vmatprep.subr.bf16.mxu1 %v2138_v3  ;;  %v614_v45 = vsel %vm316_vm5, %v2003_v39, %v2224_v15  ;;  %v613_v46 = vsel %vm316_vm5, %v2002_v40, %v2235_v21  ;;  %v2079_v21 = vld [vmem:[%s2686_s1 + $0x90] sm:$0xff]  }
 0x1dd   : > { %v2016_v28 = vpop.permute.xlu0 %2015  ;;  %v2011_v44 = vpop.permute.xlu1 %2010  ;;  %v615_v50 = vsel %vm319_vm6, %v613_v46, %v2007_v43  ;;  %v616_v51 = vsel %vm319_vm6, %v614_v45, %v2008_v42 }
 0x1de   : > { %v2018_v30 = vunpack.i.h.bf16 %v2016_v28  ;;  %v2017_v31 = vunpack.i.l.bf16 %v2016_v28  ;;  %v2013_v48 = vunpack.i.h.bf16 %v2011_v44  ;;  %v2012_v49 = vunpack.i.l.bf16 %v2011_v44 }
 0x1df   : > { %716 = vmatpush1.bf16.msra.mxu1 %v2071_v27 }
 0x1e0   : > { %717 = vmatprep.subr.bf16.mxu1 %v2138_v3  ;;  %v620_v33 = vpack.c.bf16 %v2018_v30, %v2017_v31  ;;  %v617_v52 = vsel %vm322_vm7, %v615_v50, %v2012_v49  ;;  %v618_v15 = vsel %vm322_vm7, %v616_v51, %v2013_v48 }
 0x1e1   : > { %v619_v53 = vpack.c.bf16 %v618_v15, %v617_v52 }
 0x1e2   : > { %1744 = vmatprep.mubr.msk.bf16.mxu1 %vm316_vm5, %v620_v33 }
 0x1e3   : > { %718 = vmatpush1.bf16.msra.mxu1 %v2072_v32 }
 0x1e4   : > { %719 = vmatprep.subr.bf16.mxu1 %v2138_v3 }
 0x1e7   : > { %720 = vmatpush1.bf16.msra.mxu1 %v2073_v34 }
 0x1e8   : > { %721 = vmatprep.subr.bf16.mxu1 %v2138_v3 }
 0x1eb   : > { %722 = vmatpush1.bf16.msra.mxu1 %v2074_v35 }
 0x1ec   : > { %723 = vmatprep.subr.bf16.mxu1 %v2138_v3 }
 0x1ef   : > { %724 = vmatpush1.bf16.msra.mxu1 %v2075_v36 }
 0x1f0   : > { %725 = vmatprep.subr.bf16.mxu1 %v2138_v3 }
 0x1f3   : > { %726 = vmatpush1.bf16.msra.mxu1 %v2076_v38 }
 0x1f4   : > { %727 = vmatprep.subr.bf16.mxu1 %v2138_v3 }
 0x1f7   : > { %728 = vmatpush1.bf16.msra.mxu1 %v2077_v41 }
 0x1f8   : > { %741 = vmatprep.subr.bf16.mxu1 %v2138_v3 }
 0x1fb   : > { %742 = vmatpush2.bf16.msra.mxu1 %v2078_v47 }
 0x1fc   : > { %743 = vmatprep.subr.bf16.mxu1 %v2138_v3 }
 0x1ff   : > { %744 = vmatpush2.bf16.msra.mxu1 %v2079_v21 }
 0x200   : > { %1938 = vmatprep.subr.bf16.mxu1 %v2142_v55 }
 0x202   : > { %746 = vmatmul.mubr.bf16.vlgmr.msra.gmra.mxu1 %v619_v53 }
 0x203   : > { %1950 = vmatprep.mubr.msk.bf16.mxu1 %vm2143_vm8, %v2142_v55 }
 0x29a   : > { %v573_v56 = vpop.f32.mrf.mxu1 }
 0x29b   : > { %v574_v57 = vadd.f32 %v1704_v54, %v573_v56  ;;  %v2086_v54 = vld [vmem:[%s2686_s1 + $0xd8] sm:$0xff]  }
 0x29c   : > { %v1920_v58 = vpop.f32.mrf.mxu1 }
 0x29d   : > { %2118 = vtanh.f32 %v574_v57  ;;  %v2087_v57 = vld [vmem:[%s2686_s1 + $0xd0] sm:$0xff]   ;;  %v2088_v58 = vld [vmem:[%s2686_s1 + $0xc8] sm:$0xff]  }
 0x29e   : > { %v576_v59 = vpop.f32.mrf.mxu1 }
 0x29f   : > { %v2089_v59 = vld [vmem:[%s2686_s1 + $0xc0] sm:$0xff]  }
 0x2a0   : > { %v1921_v60 = vpop.f32.mrf.mxu1 }
 0x2a1   : > { %v2090_v60 = vld [vmem:[%s2686_s1 + $0xb8] sm:$0xff]  }
 0x2aa   : > { %v2119_v61 = vpop.eup %2118 }
 0x2ab   : > { %v580_v62 = vmul.f32 1.442695, %v2119_v61  ;;  %v2091_v61 = vld [vmem:[%s2686_s1 + $0xb0] sm:$0xff]  }
 0x2ad   : > { %2120 = vpow2.f32 %v580_v62  ;;  %v2092_v62 = vld [vmem:[%s2686_s1 + $0xa8] sm:$0xff]  }
 0x2ba   : > { %v2121_v4 = vpop.eup %2120 }
 0x2bb   : > { %583 = vrot.lane.b32.xlu1 %v2121_v4, %s2139_s13 }
 0x2c2   : > { %v747_v11 = vpop.f32.mrf.mxu1 }
 0x2c3   : > { %v748_v14 = vadd.f32 %v1733_v9, %v747_v11 }
 0x2c4   : > { %v749_v16 = vpop.f32.mrf.mxu1 }
 0x2c5   : > { %vm754_vm11 = vcmp.ge.f32.partialorder %v748_v14, 0.0  ;;  %v756_v17 = vmul.f32 0.01, %v748_v14 }
 0x2c6   : > { %v750_v18 = vpop.f32.mrf.mxu1 }
 0x2c7   : > { %v758_v19 = vsel %vm754_vm11, %v748_v14, %v756_v17  ;;  %v751_v20 = vadd.f32 %v1733_v9, %v750_v18 }
 0x2c8   : > { %v752_v22 = vpop.f32.mrf.mxu1  ;;  %v762_v24 = vrot.slane %v758_v19, 1  ;;  %v768_v25 = vrot.slane %v758_v19, 2 }
 0x2c9   : > { %vm755_vm12 = vcmp.ge.f32.partialorder %v751_v20, 0.0  ;;  %v757_v23 = vmul.f32 0.01, %v751_v20 }
 0x2cb   : > { %v759_v26 = vsel %vm755_vm12, %v751_v20, %v757_v23 }
 0x2cc   : > { %v763_v12 = vrot.slane %v759_v26, 1  ;;  %v769_v13 = vrot.slane %v759_v26, 2 }
 0x2ce   : > { %v764_v29 = vsel %vm280_vm1, %v762_v24, %v763_v12  ;;  %v770_v27 = vsel %vm290_vm2, %v768_v25, %v769_v13 }
 0x2cf   : > { %765 = vrot.lane.b32.xlu0 %v764_v29, %s2139_s13  ;;  %771 = vrot.lane.b32.xlu1 %v770_v27, %s2141_s17 }
 0x32d   : > { %v584_v28 = vpop.permute.xlu1 %583 }
 0x32e   : > { %v2434_v30 = vmul.f32 %v584_v28, %v2205_v7 }
 0x330   : > { %v884_v31 = vrot.slane %v2434_v30, %v2197_v5  ;;  %v888_v32 = vrot.slane %v2434_v30, %v2199_v6  ;;  %v890_v33 = vrot.slane %v2434_v30, 5 }
 0x332   : > { %v892_v34 = vsel %vm275_vm0, %v884_v31, %v890_v33  ;;  %v2443_v35 = vsel %vm275_vm0, %v890_v33, %v888_v32  ;;  %v2096_v31 = vld [vmem:[%s2688_s3 + $0x88] sm:$0xff]   ;;  %v2097_v33 = vld [vmem:[%s2688_s3 + $0x80] sm:$0xff]  }
 0x333   : > { %v2019_v36 = vpack.i.bf16 %v2443_v35, %v892_v34  ;;  %v907_v37 = vrot.slane %v892_v34, 2  ;;  %v908_v38 = vrot.slane %v2443_v35, 2  ;;  %v916_v39 = vrot.slane %v892_v34, 3  ;;  %1939 = vmatpush3.bf16.msra.mxu1 %v2096_v31  ;;  %v2106_v31 = vld [vmem:[%s2686_s1 + $0x108] sm:$0xff]  }
 0x334   : > { %v917_v40 = vrot.slane %v2443_v35, 3  ;;  %v925_v41 = vrot.slane %v892_v34, 4  ;;  %v926_v42 = vrot.slane %v2443_v35, 4  ;;  %v902_v43 = vrot.slane %v892_v34, 1  ;;  %1940 = vmatprep.subr.bf16.mxu1 %v2142_v55 }
 0x335   : > { %2020 = vrot.lane.b32.xlu0 %v2019_v36, %s2140_s14  ;;  %v909_v44 = vsel %vm290_vm2, %v907_v37, %v908_v38  ;;  %v903_v45 = vrot.slane %v2443_v35, 1  ;;  %v2098_v35 = vld [vmem:[%s2688_s3 + $0x78] sm:$0xff]   ;;  %v2099_v36 = vld [vmem:[%s2688_s3 + $0x70] sm:$0xff]   ;;  %v2100_v37 = vld [vmem:[%s2688_s3 + $0x68] sm:$0xff]  }
 0x336   : > { %v2024_v46 = vpack.i.bf16 %v908_v38, %v909_v44  ;;  %v918_v47 = vsel %vm300_vm3, %v916_v39, %v917_v40  ;;  %v927_v49 = vsel %vm310_vm4, %v925_v41, %v926_v42  ;;  %v1758_v38 = vld [vmem:[%s2689_s4 + $0x1] ss:$0 sm:$0xff]  ;;  %v1787_v44 = vld [vmem:[%s2687_s2 + $0x2] ss:$0 sm:$0xff] }
 0x337   : > { %v2029_v48 = vpack.i.bf16 %v917_v40, %v918_v47  ;;  %v904_v50 = vsel %vm280_vm1, %v902_v43, %v903_v45  ;;  %v2034_v51 = vpack.i.bf16 %v926_v42, %v927_v49  ;;  %1941 = vmatpush3.bf16.msra.mxu1 %v2097_v33  ;;  %v2108_v33 = vld [vmem:[%s2686_s1 + $0xf8] sm:$0xff]  }
 0x338   : > { %2025 = vrot.lane.b32.xlu1 %v2024_v46, %s2139_s13  ;;  %1942 = vmatprep.subr.bf16.mxu1 %v2142_v55  ;;  %v2101_v46 = vld [vmem:[%s2688_s3 + $0x60] sm:$0xff]  }
 0x339   : > { %2030 = vrot.lane.b32.xlu0 %v2029_v48, %s2141_s17 }
 0x33b   : > { %1943 = vmatpush3.bf16.msra.mxu1 %v2098_v35  ;;  %v2109_v35 = vld [vmem:[%s2686_s1 + $0xf0] sm:$0xff]  }
 0x33c   : > { %2035 = vrot.lane.b32.xlu1 %v2034_v51, %s2140_s14  ;;  %1944 = vmatprep.subr.bf16.mxu1 %v2142_v55 }
 0x33f   : > { %1945 = vmatpush3.bf16.msra.mxu1 %v2099_v36 }
 0x340   : > { %1946 = vmatprep.subr.bf16.mxu1 %v2142_v55 }
 0x341   : > { %v766_v52 = vpop.permute.xlu0 %765  ;;  %v772_v15 = vpop.permute.xlu1 %771 }
 0x342   : > { %v774_v21 = vsel %vm316_vm5, %v758_v19, %v766_v52 }
 0x343   : > { %v775_v53 = vsel %vm319_vm6, %v774_v21, %v772_v15  ;;  %1947 = vmatpush3.bf16.msra.mxu1 %v2100_v37 }
 0x344   : > { %v776_v56 = vpack.c.bf16 %v775_v53, %v775_v53  ;;  %1948 = vmatprep.subr.bf16.mxu1 %v2142_v55 }
 0x346   : > { %1935 = vmatmul.mubr.msk.bf16.vlgmr.msra.gmra.mxu0 %vm322_vm7, %v776_v56 }
 0x347   : > { %1035 = vmatpush1.bf16.msra.mxu0 %v2086_v54  ;;  %1949 = vmatpush3.bf16.msra.mxu1 %v2101_v46 }
 0x348   : > { %1036 = vmatprep.subr.bf16.mxu0 %v2138_v3  ;;  %1347 = vmatprep.subr.bf16.mxu1 %v2138_v3 }
 0x34b   : > { %1037 = vmatpush1.bf16.msra.mxu0 %v2087_v57 }
 0x34c   : > { %1038 = vmatprep.subr.bf16.mxu0 %v2138_v3 }
 0x34f   : > { %1039 = vmatpush1.bf16.msra.mxu0 %v2088_v58 }
 0x350   : > { %1040 = vmatprep.subr.bf16.mxu0 %v2138_v3 }
 0x353   : > { %1041 = vmatpush1.bf16.msra.mxu0 %v2089_v59 }
 0x354   : > { %1042 = vmatprep.subr.bf16.mxu0 %v2138_v3 }
 0x357   : > { %1043 = vmatpush1.bf16.msra.mxu0 %v2090_v60 }
 0x358   : > { %1044 = vmatprep.subr.bf16.mxu0 %v2138_v3 }
 0x35b   : > { %1045 = vmatpush1.bf16.msra.mxu0 %v2091_v61 }
 0x35c   : > { %1046 = vmatprep.subr.bf16.mxu0 %v2138_v3 }
 0x35f   : > { %1047 = vmatpush1.bf16.msra.mxu0 %v2092_v62 }
 0x360   : > { %1048 = vmatprep.subr.bf16.mxu0 %v2138_v3 }
 0x363   : > { %1049 = vmatpush1.bf16.msra.mxu0 %v2093_v63 }
 0x364   : > { %1062 = vmatprep.subr.bf16.mxu0 %v2138_v3 }
 0x367   : > { %1063 = vmatpush2.bf16.msra.mxu0 %v2094_v0 }
 0x368   : > { %1064 = vmatprep.subr.bf16.mxu0 %v2138_v3 }
 0x36b   : > { %1065 = vmatpush2.bf16.msra.mxu0 %v2095_v1 }
 0x36c   : > { %1954 = vmatprep.subr.bf16.mxu0 %v2142_v55 }
 0x3a7   : > { %v2021_v2 = vpop.permute.xlu0 %2020 }
 0x3a8   : > { %v2023_v4 = vunpack.i.h.bf16 %v2021_v2  ;;  %v2022_v8 = vunpack.i.l.bf16 %v2021_v2 }
 0x3aa   : > { %v2026_v9 = vpop.permute.xlu1 %2025  ;;  %v935_v16 = vsel %vm316_vm5, %v2023_v4, %v903_v45  ;;  %v934_v17 = vsel %vm316_vm5, %v2022_v8, %v904_v50 }
 0x3ab   : > { %v2028_v10 = vunpack.i.h.bf16 %v2026_v9  ;;  %v2027_v11 = vunpack.i.l.bf16 %v2026_v9  ;;  %v2031_v14 = vpop.permute.xlu0 %2030 }
 0x3ac   : > { %v2033_v18 = vunpack.i.h.bf16 %v2031_v14  ;;  %v2032_v19 = vunpack.i.l.bf16 %v2031_v14 }
 0x3ad   : > { %v936_v20 = vsel %vm319_vm6, %v934_v17, %v2027_v11  ;;  %v937_v22 = vsel %vm319_vm6, %v935_v16, %v2028_v10 }
 0x3ae   : > { %v938_v23 = vsel %vm322_vm7, %v936_v20, %v2032_v19  ;;  %v939_v24 = vsel %vm322_vm7, %v937_v22, %v2033_v18  ;;  %v2036_v25 = vpop.permute.xlu1 %2035 }
 0x3af   : > { %v940_v26 = vpack.c.bf16 %v939_v24, %v938_v23  ;;  %v2038_v12 = vunpack.i.h.bf16 %v2036_v25  ;;  %v2037_v13 = vunpack.i.l.bf16 %v2036_v25 }
 0x3b1   : > { %v941_v29 = vpack.c.bf16 %v2038_v12, %v2037_v13 }
 0x3b3   : > { %1798 = vmatprep.mubr.msk.bf16.mxu0 %vm316_vm5, %v941_v29  ;;  %v2103_v29 = vld [vmem:[%s2686_s1 + $0x120] sm:$0xff]  }
 0x3b4   : > { %1067 = vmatmul.mubr.bf16.vlgmr.msra.gmra.mxu0 %v940_v26  ;;  %v2102_v26 = vld [vmem:[%s2686_s1 + $0x128] sm:$0xff]  }
 0x3b5   : > { %1966 = vmatprep.mubr.msk.bf16.mxu0 %vm2143_vm8, %v2142_v55 }
 0x406   : > { %v871_v27 = vpop.f32.mrf.mxu0 }
 0x407   : > { %v872_v39 = vadd.f32 %v1758_v38, %v871_v27  ;;  %v2104_v27 = vld [vmem:[%s2686_s1 + $0x118] sm:$0xff]  }
 0x408   : > { %v1936_v28 = vpop.f32.mrf.mxu0 }
 0x409   : > { %2122 = vtanh.f32 %v872_v39  ;;  %v2105_v28 = vld [vmem:[%s2686_s1 + $0x110] sm:$0xff]  }
 0x40a   : > { %v874_v32 = vpop.f32.mrf.mxu0 }
 0x40b   : > { %v2107_v32 = vld [vmem:[%s2686_s1 + $0x100] sm:$0xff]  }
 0x40c   : > { %v1937_v34 = vpop.f32.mrf.mxu0 }
 0x416   : > { %v2123_v40 = vpop.eup %2122 }
 0x417   : > { %v878_v41 = vmul.f32 1.442695, %v2123_v40  ;;  %v2110_v40 = vld [vmem:[%s2686_s1 + $0x138] sm:$0xff]  }
 0x419   : > { %2124 = vpow2.f32 %v878_v41 }
 0x426   : > { %v2125_v42 = vpop.eup %2124 }
 0x427   : > { %v2534_v43 = vmul.f32 %v2125_v42, %v2205_v7 }
 0x429   : > { %v1203_v48 = vrot.slane %v2534_v43, %v2197_v5  ;;  %v1207_v49 = vrot.slane %v2534_v43, %v2199_v6  ;;  %v1209_v50 = vrot.slane %v2534_v43, 5 }
 0x42b   : > { %v2549_v21 = vsel %vm275_vm0, %v1203_v48, %v1209_v50  ;;  %v2552_v53 = vsel %vm275_vm0, %v1209_v50, %v1207_v49  ;;  %v2111_v48 = vld [vmem:[%s2686_s1 + $0x130] sm:$0xff]  }
 0x42c   : > { %v1224_v56 = vrot.slane %v2549_v21, 2  ;;  %v1225_v57 = vrot.slane %v2552_v53, 2  ;;  %v1215_v58 = vrot.slane %v2549_v21, 1  ;;  %v1216_v59 = vrot.slane %v2552_v53, 1 }
 0x42d   : > { %v1233_v1 = vrot.slane %v2549_v21, 3  ;;  %v1234_v2 = vrot.slane %v2552_v53, 3  ;;  %v1242_v18 = vrot.slane %v2549_v21, 4  ;;  %v1243_v19 = vrot.slane %v2552_v53, 4 }
 0x42e   : > { %v1226_v9 = vsel %vm290_vm2, %v1224_v56, %v1225_v57  ;;  %v1217_v10 = vsel %vm280_vm1, %v1215_v58, %v1216_v59  ;;  %v1841_v58 = vld [vmem:[%s2687_s2 + $0x3] ss:$0 sm:$0xff] }
 0x42f   : > { %v2044_v11 = vpack.i.bf16 %v1225_v57, %v1226_v9  ;;  %v2039_v14 = vpack.i.bf16 %v1216_v59, %v1217_v10  ;;  %v1235_v16 = vsel %vm300_vm3, %v1233_v1, %v1234_v2  ;;  %v1244_v24 = vsel %vm310_vm4, %v1242_v18, %v1243_v19 }
 0x430   : > { %v2049_v17 = vpack.i.bf16 %v1234_v2, %v1235_v16  ;;  %v1254_v13 = vpack.c.bf16 %v1243_v19, %v1244_v24  ;;  %v1866_v24 = vld [vmem:[%s2689_s4 + $0x3] ss:$0 sm:$0xff] }
 0x474   : > { %v1068_v45 = vpop.f32.mrf.mxu0 }
 0x475   : > { %v1069_v47 = vadd.f32 %v1787_v44, %v1068_v45 }
 0x476   : > { %v1070_v7 = vpop.f32.mrf.mxu0 }
 0x477   : > { %v1077_v51 = vmul.f32 0.01, %v1069_v47  ;;  %vm1075_vm13 = vcmp.ge.f32.partialorder %v1069_v47, 0.0 }
 0x478   : > { %v1071_v52 = vpop.f32.mrf.mxu0 }
 0x479   : > { %v1072_v15 = vadd.f32 %v1787_v44, %v1071_v52  ;;  %v1079_v54 = vsel %vm1075_vm13, %v1069_v47, %v1077_v51 }
 0x47a   : > { %v1073_v5 = vpop.f32.mrf.mxu0  ;;  %v1089_v63 = vrot.slane %v1079_v54, 2  ;;  %v1083_v0 = vrot.slane %v1079_v54, 1 }
 0x47b   : > { %vm1076_vm14 = vcmp.ge.f32.partialorder %v1072_v15, 0.0  ;;  %v1078_v6 = vmul.f32 0.01, %v1072_v15  ;;  %v2116_v5 = vld [vmem:[%s2688_s3 + $0x98] sm:$0xff]  }
 0x47d   : > { %v1080_v60 = vsel %vm1076_vm14, %v1072_v15, %v1078_v6  ;;  %v2112_v15 = vld [vmem:[%s2688_s3 + $0xb8] sm:$0xff]  }
 0x47e   : > { %v1084_v61 = vrot.slane %v1080_v60, 1  ;;  %v1090_v62 = vrot.slane %v1080_v60, 2  ;;  %1955 = vmatpush3.bf16.msra.mxu0 %v2112_v15  ;;  %v2117_v60 = vld [vmem:[%s2688_s3 + $0x90] sm:$0xff]  }
 0x47f   : > { %1956 = vmatprep.subr.bf16.mxu0 %v2142_v55 }
 0x480   : > { %v1091_v4 = vsel %vm290_vm2, %v1089_v63, %v1090_v62  ;;  %v1085_v8 = vsel %vm280_vm1, %v1083_v0, %v1084_v61 }
 0x481   : > { %1092 = vrot.lane.b32.xlu1 %v1091_v4, %s2141_s17  ;;  %1086 = vrot.lane.b32.xlu0 %v1085_v8, %s2139_s13 }
 0x485   : > { %2045 = vrot.lane.b32.xlu1 %v2044_v11, %s2141_s17  ;;  %2040 = vrot.lane.b32.xlu0 %v2039_v14, %s2139_s13 }
 0x489   : > { %2050 = vrot.lane.b32.xlu0 %v2049_v17, %s2140_s14 }
 0x4f3   : > { %v1093_v20 = vpop.permute.xlu1 %1092  ;;  %v1087_v22 = vpop.permute.xlu0 %1086 }
 0x4f4   : > { %v1095_v23 = vsel %vm316_vm5, %v1079_v54, %v1087_v22 }
 0x4f5   : > { %v1096_v25 = vsel %vm319_vm6, %v1095_v23, %v1093_v20 }
 0x4f6   : > { %v1097_v12 = vpack.c.bf16 %v1096_v25, %v1096_v25 }
 0x4f7   : > { %v2041_v34 = vpop.permute.xlu0 %2040  ;;  %v2046_v36 = vpop.permute.xlu1 %2045 }
 0x4f8   : > { %1951 = vmatmul.mubr.msk.bf16.vlgmr.msra.gmra.mxu1 %vm322_vm7, %v1097_v12  ;;  %v2043_v37 = vunpack.i.h.bf16 %v2041_v34  ;;  %v2042_v38 = vunpack.i.l.bf16 %v2041_v34  ;;  %v2048_v41 = vunpack.i.h.bf16 %v2046_v36  ;;  %v2047_v42 = vunpack.i.l.bf16 %v2046_v36 }
 0x4f9   : > { %1348 = vmatpush1.bf16.msra.mxu1 %v2102_v26  ;;  %1852 = vmatprep.mubr.msk.bf16.mxu1 %vm316_vm5, %v1254_v13 }
 0x4fa   : > { %1349 = vmatprep.subr.bf16.mxu1 %v2138_v3  ;;  %v1248_v44 = vsel %vm316_vm5, %v2552_v53, %v2043_v37  ;;  %v1247_v45 = vsel %vm316_vm5, %v2549_v21, %v2042_v38  ;;  %v2113_v21 = vld [vmem:[%s2688_s3 + $0xb0] sm:$0xff]   ;;  %v2115_v53 = vld [vmem:[%s2688_s3 + $0xa0] sm:$0xff]  }
 0x4fb   : > { %v2051_v39 = vpop.permute.xlu0 %2050  ;;  %v1249_v49 = vsel %vm319_vm6, %v1247_v45, %v2047_v42  ;;  %v1250_v50 = vsel %vm319_vm6, %v1248_v44, %v2048_v41  ;;  %1957 = vmatpush3.bf16.msra.mxu0 %v2113_v21 }
 0x4fc   : > { %v2053_v46 = vunpack.i.h.bf16 %v2051_v39  ;;  %v2052_v47 = vunpack.i.l.bf16 %v2051_v39  ;;  %1958 = vmatprep.subr.bf16.mxu0 %v2142_v55 }
 0x4fd   : > { %1350 = vmatpush1.bf16.msra.mxu1 %v2103_v29 }
 0x4fe   : > { %1351 = vmatprep.subr.bf16.mxu1 %v2138_v3  ;;  %v1251_v7 = vsel %vm322_vm7, %v1249_v49, %v2052_v47  ;;  %v1252_v51 = vsel %vm322_vm7, %v1250_v50, %v2053_v46 }
 0x4ff   : > { %v1253_v52 = vpack.c.bf16 %v1252_v51, %v1251_v7 }
 0x501   : > { %1352 = vmatpush1.bf16.msra.mxu1 %v2104_v27 }
 0x502   : > { %1353 = vmatprep.subr.bf16.mxu1 %v2138_v3 }
 0x505   : > { %1354 = vmatpush1.bf16.msra.mxu1 %v2105_v28  ;;  %v1812_v28 = vld [vmem:[%s2689_s4 + $0x2] ss:$0 sm:$0xff] }
 0x506   : > { %1355 = vmatprep.subr.bf16.mxu1 %v2138_v3 }
 0x509   : > { %1356 = vmatpush1.bf16.msra.mxu1 %v2106_v31 }
 0x50a   : > { %1357 = vmatprep.subr.bf16.mxu1 %v2138_v3 }
 0x50d   : > { %1358 = vmatpush1.bf16.msra.mxu1 %v2107_v32 }
 0x50e   : > { %1359 = vmatprep.subr.bf16.mxu1 %v2138_v3 }
 0x511   : > { %1360 = vmatpush1.bf16.msra.mxu1 %v2108_v33 }
 0x512   : > { %1361 = vmatprep.subr.bf16.mxu1 %v2138_v3 }
 0x515   : > { %1362 = vmatpush1.bf16.msra.mxu1 %v2109_v35 }
 0x516   : > { %1375 = vmatprep.subr.bf16.mxu1 %v2138_v3 }
 0x519   : > { %1376 = vmatpush2.bf16.msra.mxu1 %v2110_v40 }
 0x51a   : > { %1377 = vmatprep.subr.bf16.mxu1 %v2138_v3  ;;  %v2114_v3 = vld [vmem:[%s2688_s3 + $0xa8] sm:$0xff]  }
 0x51b   : > { %1959 = vmatpush3.bf16.msra.mxu0 %v2114_v3 }
 0x51c   : > { %1960 = vmatprep.subr.bf16.mxu0 %v2142_v55 }
 0x51d   : > { %1378 = vmatpush2.bf16.msra.mxu1 %v2111_v48 }
 0x51f   : > { %1961 = vmatpush3.bf16.msra.mxu0 %v2115_v53 }
 0x520   : > { %1380 = vmatmul.mubr.bf16.vlgmr.msra.gmra.mxu1 %v1253_v52  ;;  %1962 = vmatprep.subr.bf16.mxu0 %v2142_v55 }
 0x523   : > { %1963 = vmatpush3.bf16.msra.mxu0 %v2116_v5 }
 0x524   : > { %1964 = vmatprep.subr.bf16.mxu0 %v2142_v55 }
 0x527   : > { %1965 = vmatpush3.bf16.msra.mxu0 %v2117_v60 }
 0x5b8   : > { %v1192_v54 = vpop.f32.mrf.mxu1 }
 0x5b9   : > { %v1193_v31 = vadd.f32 %v1812_v28, %v1192_v54 }
 0x5ba   : > { %v1952_v6 = vpop.f32.mrf.mxu1 }
 0x5bc   : > { %v1195_v56 = vpop.f32.mrf.mxu1 }
 0x5be   : > { %v1953_v57 = vpop.f32.mrf.mxu1 }
 0x5e0   : > { %v1381_v59 = vpop.f32.mrf.mxu1 }
 0x5e1   : > { %v1382_v61 = vadd.f32 %v1841_v58, %v1381_v59 }
 0x5e2   : > { %v1383_v62 = vpop.f32.mrf.mxu1 }
 0x5e3   : > { %v1390_v63 = vmul.f32 0.01, %v1382_v61  ;;  %vm1388_vm15 = vcmp.ge.f32.partialorder %v1382_v61, 0.0 }
 0x5e4   : > { %v1384_v0 = vpop.f32.mrf.mxu1 }
 0x5e5   : > { %v1385_v55 = vadd.f32 %v1841_v58, %v1384_v0  ;;  %v1392_v2 = vsel %vm1388_vm15, %v1382_v61, %v1390_v63 }
 0x5e6   : > { %v1386_v1 = vpop.f32.mrf.mxu1  ;;  %v1402_v11 = vrot.slane %v1392_v2, 2  ;;  %v1396_v14 = vrot.slane %v1392_v2, 1 }
 0x5e7   : > { %vm1389_vm0 = vcmp.ge.f32.partialorder %v1385_v55, 0.0  ;;  %v1391_v4 = vmul.f32 0.01, %v1385_v55 }
 0x5e9   : > { %v1393_v8 = vsel %vm1389_vm0, %v1385_v55, %v1391_v4 }
 0x5ea   : > { %v1397_v9 = vrot.slane %v1393_v8, 1  ;;  %v1403_v10 = vrot.slane %v1393_v8, 2 }
 0x5ec   : > { %v1404_v16 = vsel %vm290_vm2, %v1402_v11, %v1403_v10  ;;  %v1398_v17 = vsel %vm280_vm1, %v1396_v14, %v1397_v9  ;;  %vm1549_vm1 = vcmask 64512  }
 0x5ed   : > { %1405 = vrot.lane.b32.xlu0 %v1404_v16, %s2141_s17  ;;  %1399 = vrot.lane.b32.xlu1 %v1398_v17, %s2139_s13 }
 0x65f   : > { %v1406_v18 = vpop.permute.xlu0 %1405  ;;  %v1400_v19 = vpop.permute.xlu1 %1399 }
 0x660   : > { %v1408_v20 = vsel %vm316_vm5, %v1392_v2, %v1400_v19 }
 0x661   : > { %v1409_v22 = vsel %vm319_vm6, %v1408_v20, %v1406_v18 }
 0x662   : > { %v1410_v23 = vpack.c.bf16 %v1409_v22, %v1409_v22 }
 0x664   : > { %1967 = vmatmul.mubr.msk.bf16.vlgmr.msra.gmra.mxu0 %vm322_vm7, %v1410_v23 }
 0x724   : > { %v1505_v25 = vpop.f32.mrf.mxu0 }
 0x725   : > { %v1506_v26 = vadd.f32 %v1866_v24, %v1505_v25 }
 0x726   : > { %v1968_v12 = vpop.f32.mrf.mxu0 }
 0x727   : > { %2126 = vtanh.f32 %v1506_v26 }
 0x728   : > { %v1508_v13 = vpop.f32.mrf.mxu0  ;;  %2128 = vtanh.f32 %v1193_v31 }
 0x72a   : > { %v1969_v29 = vpop.f32.mrf.mxu0 }
 0x734   : > { %v2127_v27 = vpop.eup %2126 }
 0x735   : > { %1513 = vrot.lane.b32.xlu1 %v2127_v27, %s2139_s13  ;;  %v2129_v32 = vpop.eup %2128  ;;  %s256_s13 = scalar_lea.vmem %s2690_s5, %s1876_s15 }
 0x736   : > { %v1199_v33 = vadd.f32 %v2129_v32, %v2534_v43 }
 0x75e   : > { %1517 = vxpose.xlu1.b32.start.end [1/1] (short) (narrow) %v1199_v33, 32 }
 0x7a7   : > { %v1514_v34 = vpop.permute.xlu1 %1513 }
 0x7a8   : > { %v1516_v35 = vsub.f32 %v2434_v30, %v1514_v34 }
 0x7aa   : > { %1555 = vrot.lane.b32.xlu0 %v1516_v35, %s2140_s14 }
 0x7da   : > { %v1533_v36 = vpop.trf.xlu1 }
 0x7db   : > { %1550 = vst.msk [vmem:[%s256_s13] sm:$0xff] %vm1549_vm1, %v1533_v36 }
 0x7de   : > { %v1534_v38 = vpop.trf.xlu1 }
 0x7df   : > { %1551 = vst.msk [vmem:[%s256_s13 + $0x8] sm:$0xff] %vm1549_vm1, %v1534_v38 }
 0x7e2   : > { %v1535_v43 = vpop.trf.xlu1 }
 0x7e3   : > { %1552 = vst.msk [vmem:[%s256_s13 + $0x10] sm:$0xff] %vm1549_vm1, %v1535_v43 }
 0x7e6   : > { %v1536_v30 = vpop.trf.xlu1 }
 0x7e7   : > { %1553 = vst.msk [vmem:[%s256_s13 + $0x18] sm:$0xff] %vm1549_vm1, %v1536_v30 }
 0x81c   : > { %v1556_v37 = vpop.permute.xlu0 %1555 }
 0x81d   : > { %1558 = vxpose.xlu0.b32.start.end [1/1] (short) (narrow) %v1556_v37, 32 }
 0x899   : > { %v1574_v39 = vpop.trf.xlu0 }
 0x89a   : > { %1590 = vst.msk [vmem:[%s261_s19] sm:$0xff] %vm1549_vm1, %v1574_v39 }
 0x89d   : > { %v1575_v40 = vpop.trf.xlu0 }
 0x89e   : > { %1591 = vst.msk [vmem:[%s261_s19 + $0x8] sm:$0xff] %vm1549_vm1, %v1575_v40 }
 0x8a1   : > { %v1576_v41 = vpop.trf.xlu0 }
 0x8a2   : > { %1592 = vst.msk [vmem:[%s261_s19 + $0x10] sm:$0xff] %vm1549_vm1, %v1576_v41 }
 0x8a5   : > { %v1577_v42 = vpop.trf.xlu0 }
 0x8a6   : > { %1593 = vst.msk [vmem:[%s261_s19 + $0x18] sm:$0xff] %vm1549_vm1, %v1577_v42 }
 0x8a7 PF: > { %s17_s21 = sadd.s32 1, %s2136_s21  }
 0x8a8   : > { %p14_p4 = scmp.ge.s32.totalorder %s17_s21, 4  }
 0x8aa   :  { %16 = sbr.rel (!%p14_p4) target bundleno = 1 (0x1), region = 94 }

</bundles_post_ra>
